<compile_context>
chip_gen: v7x
topology: tpu7x:2x2x1
jax: 0.10.0
libtpu: 0.0.40
codegen_flags: <defaults>
</compile_context>

<pallas_src>
import jax
import jax.numpy as jnp
import numpy as np
from jax.experimental import pallas as pl
from jax.experimental.pallas import tpu as pltpu

EPS = 1e-5
LANE = 128
VMEM_LIMIT_BYTES = 48 * 1024 * 1024      # v7x-safe scoped-VMEM ceiling
VMEM_BUDGET_BYTES = int(0.8 * VMEM_LIMIT_BYTES)


def _round_up(x, m):
    return (x + m - 1) // m * m


# ------------------------------ Pallas kernels --------------------------------
def conv_stats_kernel(xt_ref, w_ref, y_ref, psum_ref, psumsq_ref, col_ref):
    """Pass 1: 3x3 conv via im2col + one MXU matmul, plus partial BN stats.

    xt_ref    : (TH+2, W+2, Cin_p) zero-padded f32 input tile (H halo included)
    w_ref     : (9*Cin_p, Cout_p)  tap-major bf16 conv weights (resident)
    y_ref     : (TH, W, Cout_p)    raw conv output tile (f32)
    psum_ref  : (8, Cout_p)        per-tile partial channel sums
    psumsq_ref: (8, Cout_p)        per-tile partial channel sum-of-squares
    col_ref   : (TH*W, 9*Cin_p)    im2col VMEM scratch (bf16)
    """
    th2, wp2, cinp = xt_ref.shape
    th, wd = th2 - 2, wp2 - 2
    coutp = y_ref.shape[-1]

    x = xt_ref[...]  # f32 tile (kept in f32; only MXU operands are bf16)
    for kh in range(3):
        for kw in range(3):
            tap = kh * 3 + kw
            col_ref[:, tap * cinp:(tap + 1) * cinp] = (
                x[kh:kh + th, kw:kw + wd, :]
                .reshape(th * wd, cinp)
                .astype(jnp.bfloat16))

    # Single deep contraction on the MXU: bf16 operands, f32 accumulation.
    acc = jnp.dot(col_ref[...], w_ref[...], preferred_element_type=jnp.float32)

    y_ref[...] = acc.reshape(th, wd, coutp).astype(y_ref.dtype)
    psum_ref[...] = acc.reshape(-1, 8, coutp).sum(axis=0)
    psumsq_ref[...] = (acc * acc).reshape(-1, 8, coutp).sum(axis=0)


def affine_relu_kernel(y_ref, scale_ref, shift_ref, o_ref):
    """Pass 2: folded BatchNorm (per-channel affine) + ReLU on one tile."""
    coutp = o_ref.shape[-1]
    s = scale_ref[...].reshape(1, 1, coutp)
    b = shift_ref[...].reshape(1, 1, coutp)
    o_ref[...] = jnp.maximum(y_ref[...] * s + b, 0.0).astype(o_ref.dtype)


# ------------------------------ host-side wrappers -----------------------------
def _pick_tile_h(H, W, cinp, coutp):
    """Largest H tile (divisor of H) whose working set fits the VMEM budget."""
    for th in range(H, 0, -1):
        if H % th != 0 or (th * W) % 8 != 0:
            continue
        need = (
            2 * (th + 2) * (W + 2) * cinp * 4    # input tile (f32), double buffered
            + 2 * th * W * coutp * 4             # conv output tile (f32), double buffered
            + th * W * 9 * cinp * 2              # im2col scratch (bf16)
            + 2 * 9 * cinp * coutp * 2           # resident weights (bf16)
            + 2 * th * W * coutp * 4             # f32 accumulator + temps
            + 4 * 8 * coutp * 4)                 # partial-stat output blocks
        if need <= VMEM_BUDGET_BYTES:
            return th
    # TODO(synk): ragged / masked H and W tiling for shapes with no clean divisor.
    raise ValueError(f"no H tile for H={H}, W={W} fits the VMEM budget")


def _conv_bn_relu_block(x_p, w_p, gamma_p, beta_p):
    """Conv3x3(no bias) + BatchNorm2d(train) + ReLU on channel-padded NHWC input.

    x_p: (N, H, W, Cin_p) f32;  w_p: (9*Cin_p, Cout_p) bf16 tap-major;
    gamma_p/beta_p: (Cout_p,) f32 (zero in padded channels).
    Returns (N, H, W, Cout_p) f32.
    """
    N, H, W, cinp = x_p.shape
    coutp = w_p.shape[-1]
    th = _pick_tile_h(H, W, cinp, coutp)
    nh = H // th

    # Overlapping halo tiles (includes the conv zero-padding): (N, nh, th+2, W+2, Cin_p).
    xpad = jnp.pad(x_p, ((0, 0), (1, 1), (1, 1), (0, 0)))
    rows = jnp.arange(nh)[:, None] * th + jnp.arange(th + 2)[None, :]
    xt = xpad[:, rows]

    cparams = pltpu.CompilerParams(
        dimension_semantics=("parallel", "parallel"),
        vmem_limit_bytes=VMEM_LIMIT_BYTES)

    # Pass 1: conv + per-tile partial stats.
    y_raw, psum, psumsq = pl.pallas_call(
        conv_stats_kernel,
        out_shape=(
            jax.ShapeDtypeStruct((N, H, W, coutp), jnp.float32),
            jax.ShapeDtypeStruct((N, nh, 8, coutp), jnp.float32),
            jax.ShapeDtypeStruct((N, nh, 8, coutp), jnp.float32),
        ),
        grid_spec=pltpu.PrefetchScalarGridSpec(
            num_scalar_prefetch=0,
            grid=(N, nh),
            in_specs=[
                pl.BlockSpec((None, None, th + 2, W + 2, cinp),
                             lambda n, h: (n, h, 0, 0, 0)),
                pl.BlockSpec((9 * cinp, coutp), lambda n, h: (0, 0)),
            ],
            out_specs=[
                pl.BlockSpec((None, th, W, coutp), lambda n, h: (n, h, 0, 0)),
                pl.BlockSpec((None, None, 8, coutp), lambda n, h: (n, h, 0, 0)),
                pl.BlockSpec((None, None, 8, coutp), lambda n, h: (n, h, 0, 0)),
            ],
            scratch_shapes=[pltpu.VMEM((th * W, 9 * cinp), jnp.bfloat16)],
        ),
        compiler_params=cparams,
    )(xt, w_p)

    # Tiny cross-tile reduction + BN fold (training mode, biased variance).
    cnt = jnp.float32(N * H * W)
    mean = psum.sum(axis=(0, 1, 2)) / cnt
    var = jnp.maximum(psumsq.sum(axis=(0, 1, 2)) / cnt - mean * mean, 0.0)
    scale = gamma_p * jax.lax.rsqrt(var + EPS)
    shift = beta_p - mean * scale

    # Pass 2: fused affine + ReLU.
    y = pl.pallas_call(
        affine_relu_kernel,
        out_shape=jax.ShapeDtypeStruct((N, H, W, coutp), jnp.float32),
        grid_spec=pltpu.PrefetchScalarGridSpec(
            num_scalar_prefetch=0,
            grid=(N, nh),
            in_specs=[
                pl.BlockSpec((None, th, W, coutp), lambda n, h: (n, h, 0, 0)),
                pl.BlockSpec((1, coutp), lambda n, h: (0, 0)),
                pl.BlockSpec((1, coutp), lambda n, h: (0, 0)),
            ],
            out_specs=pl.BlockSpec((None, th, W, coutp),
                                   lambda n, h: (n, h, 0, 0)),
        ),
        compiler_params=cparams,
    )(y_raw, scale.reshape(1, coutp), shift.reshape(1, coutp))
    return y


def _prep_weight(w_oihw, cinp, coutp):
    """PyTorch OIHW conv weight -> tap-major (9*Cin_p, Cout_p) bf16."""
    co, ci, kh, kw = w_oihw.shape
    assert (kh, kw) == (3, 3)
    w = jnp.transpose(w_oihw, (2, 3, 1, 0))                          # (3,3,ci,co)
    w = jnp.pad(w, ((0, 0), (0, 0), (0, cinp - ci), (0, coutp - co)))
    return w.reshape(9 * cinp, coutp).astype(jnp.bfloat16)


def _pad_vec(v, cp):
    return jnp.pad(v.astype(jnp.float32), (0, cp - v.shape[0]))


@jax.jit
def double_conv(x_nchw, params):
    """DoubleConv forward. x: (N, Cin, H, W) f32 -> (N, Cout, H, W) f32."""
    N, cin, H, W = x_nchw.shape
    cout = params["g1"].shape[0]
    cinp = _round_up(cin, LANE)
    coutp = _round_up(cout, LANE)

    # TODO(synk): keep NHWC end-to-end in a full UNet; transpose/pad here only
    # to present the PyTorch NCHW interface.
    x = jnp.transpose(x_nchw, (0, 2, 3, 1))
    x = jnp.pad(x, ((0, 0), (0, 0), (0, 0), (0, cinp - cin)))

    w1 = _prep_weight(params["w1"], cinp, coutp)
    w2 = _prep_weight(params["w2"], coutp, coutp)
    g1 = _pad_vec(params["g1"], coutp)
    b1 = _pad_vec(params["b1"], coutp)
    g2 = _pad_vec(params["g2"], coutp)
    b2 = _pad_vec(params["b2"], coutp)

    h = _conv_bn_relu_block(x, w1, g1, b1)
    y = _conv_bn_relu_block(h, w2, g2, b2)
    y = y[..., :cout]
    return jnp.transpose(y, (0, 3, 1, 2))


# ------------------------------ pure-JAX reference -----------------------------
def _conv_bn_relu_ref(x_nchw, w_oihw, gamma, beta):
    h = jax.lax.conv_general_dilated(
        x_nchw, w_oihw, window_strides=(1, 1), padding=((1, 1), (1, 1)),
        dimension_numbers=("NCHW", "OIHW", "NCHW"),
        precision=jax.lax.Precision.HIGHEST)
    mean = jnp.mean(h, axis=(0, 2, 3), keepdims=True)
    var = jnp.mean((h - mean) ** 2, axis=(0, 2, 3), keepdims=True)
    hn = (h - mean) * jax.lax.rsqrt(var + EPS)
    return jnp.maximum(hn * gamma.reshape(1, -1, 1, 1) + beta.reshape(1, -1, 1, 1), 0.0)


def double_conv_ref(x, params):
    h = _conv_bn_relu_ref(x, params["w1"], params["g1"], params["b1"])
    return _conv_bn_relu_ref(h, params["w2"], params["g2"], params["b2"])


if __name__ == "__main__":
    key = jax.random.PRNGKey(0)
    N, Cin, Cout, H, W = 2, 4, 8, 16, 16
    k = jax.random.split(key, 6)

    x = jax.random.normal(k[0], (N, Cin, H, W), jnp.float32)
    params = {
        "w1": jax.random.normal(k[1], (Cout, Cin, 3, 3), jnp.float32) * 0.2,
        "w2": jax.random.normal(k[2], (Cout, Cout, 3, 3), jnp.float32) * 0.2,
        "g1": 1.0 + 0.1 * jax.random.normal(k[3], (Cout,), jnp.float32),
        "b1": 0.1 * jax.random.normal(k[4], (Cout,), jnp.float32),
        "g2": 1.0 + 0.1 * jax.random.normal(k[5], (Cout,), jnp.float32),
        "b2": jnp.zeros((Cout,), jnp.float32),
    }

    out = jax.block_until_ready(double_conv(x, params))
    ref = jax.block_until_ready(double_conv_ref(x, params))

    assert out.shape == (N, Cout, H, W), out.shape
    # bf16 MXU operands (f32 accumulation) vs f32-HIGHEST reference -> looser tol.
    np.testing.assert_allclose(np.asarray(out), np.asarray(ref), rtol=5e-2, atol=5e-2)

    print("KERNEL_OK")
</pallas_src>

<mosaic_0001>
module attributes {stable_mosaic.version = 11 : i64} {
  func.func @conv_stats_kernel(%arg0: i32, %arg1: i32, %arg2: memref<1x1x18x18x128xf32, #tpu.memory_space<vmem>>, %arg3: memref<1152x128xbf16, #tpu.memory_space<vmem>>, %arg4: memref<1x16x16x128xf32, #tpu.memory_space<vmem>>, %arg5: memref<1x1x8x128xf32, #tpu.memory_space<vmem>>, %arg6: memref<1x1x8x128xf32, #tpu.memory_space<vmem>>, %arg7: memref<256x1152xbf16, #tpu.memory_space<vmem>>) attributes {dimension_semantics = [#tpu.dimension_semantics<parallel>, #tpu.dimension_semantics<parallel>], iteration_bounds = array<i64: 2, 1>, scalar_prefetch = 0 : i64, scratch_operands = 1 : i64, tpu.core_type = #tpu.core_type<tc>, window_params = [{transform_indices = @transform_0, window_bounds = array<i64: 1, 1, 18, 18, 128>}, {pipeline_mode = #tpu.pipeline_mode<synchronous>, transform_indices = @transform_1, window_bounds = array<i64: 1152, 128>}, {transform_indices = @transform_2, window_bounds = array<i64: 1, 16, 16, 128>}, {transform_indices = @transform_3, window_bounds = array<i64: 1, 1, 8, 128>}, {transform_indices = @transform_4, window_bounds = array<i64: 1, 1, 8, 128>}]} {
    %c0 = arith.constant 0 : index
    %c0_0 = arith.constant 0 : index
    %c0_1 = arith.constant 0 : index
    %c0_2 = arith.constant 0 : index
    %c0_3 = arith.constant 0 : index
    %0 = vector.load %arg2[%c0, %c0_0, %c0_1, %c0_2, %c0_3] : memref<1x1x18x18x128xf32, #tpu.memory_space<vmem>>, vector<1x1x18x18x128xf32>
    %1 = vector.shape_cast %0 : vector<1x1x18x18x128xf32> to vector<18x18x128xf32>
    %2 = vector.extract_strided_slice %1 {offsets = [0, 0, 0], sizes = [16, 16, 128], strides = [1, 1, 1]} : vector<18x18x128xf32> to vector<16x16x128xf32>
    %3 = vector.shape_cast %2 : vector<16x16x128xf32> to vector<256x128xf32>
    %4 = arith.truncf %3 : vector<256x128xf32> to vector<256x128xbf16>
    %c0_4 = arith.constant 0 : index
    %c0_5 = arith.constant 0 : index
    %5 = vector.load %arg7[%c0_4, %c0_5] : memref<256x1152xbf16, #tpu.memory_space<vmem>>, vector<256x128xbf16>
    tpu.vector_store %arg7[%c0_4, %c0_5], %4 {strides = array<i32>} : memref<256x1152xbf16, #tpu.memory_space<vmem>>, vector<256x128xbf16>,
    %6 = vector.extract_strided_slice %1 {offsets = [0, 1, 0], sizes = [16, 16, 128], strides = [1, 1, 1]} : vector<18x18x128xf32> to vector<16x16x128xf32>
    %7 = vector.shape_cast %6 : vector<16x16x128xf32> to vector<256x128xf32>
    %8 = arith.truncf %7 : vector<256x128xf32> to vector<256x128xbf16>
    %c0_6 = arith.constant 0 : index
    %c128 = arith.constant 128 : index
    %9 = vector.load %arg7[%c0_6, %c128] : memref<256x1152xbf16, #tpu.memory_space<vmem>>, vector<256x128xbf16>
    tpu.vector_store %arg7[%c0_6, %c128], %8 {strides = array<i32>} : memref<256x1152xbf16, #tpu.memory_space<vmem>>, vector<256x128xbf16>,
    %10 = vector.extract_strided_slice %1 {offsets = [0, 2, 0], sizes = [16, 16, 128], strides = [1, 1, 1]} : vector<18x18x128xf32> to vector<16x16x128xf32>
    %11 = vector.shape_cast %10 : vector<16x16x128xf32> to vector<256x128xf32>
    %12 = arith.truncf %11 : vector<256x128xf32> to vector<256x128xbf16>
    %c0_7 = arith.constant 0 : index
    %c256 = arith.constant 256 : index
    %13 = vector.load %arg7[%c0_7, %c256] : memref<256x1152xbf16, #tpu.memory_space<vmem>>, vector<256x128xbf16>
    tpu.vector_store %arg7[%c0_7, %c256], %12 {strides = array<i32>} : memref<256x1152xbf16, #tpu.memory_space<vmem>>, vector<256x128xbf16>,
    %14 = vector.extract_strided_slice %1 {offsets = [1, 0, 0], sizes = [16, 16, 128], strides = [1, 1, 1]} : vector<18x18x128xf32> to vector<16x16x128xf32>
    %15 = vector.shape_cast %14 : vector<16x16x128xf32> to vector<256x128xf32>
    %16 = arith.truncf %15 : vector<256x128xf32> to vector<256x128xbf16>
    %c0_8 = arith.constant 0 : index
    %c384 = arith.constant 384 : index
    %17 = vector.load %arg7[%c0_8, %c384] : memref<256x1152xbf16, #tpu.memory_space<vmem>>, vector<256x128xbf16>
    tpu.vector_store %arg7[%c0_8, %c384], %16 {strides = array<i32>} : memref<256x1152xbf16, #tpu.memory_space<vmem>>, vector<256x128xbf16>,
    %18 = vector.extract_strided_slice %1 {offsets = [1, 1, 0], sizes = [16, 16, 128], strides = [1, 1, 1]} : vector<18x18x128xf32> to vector<16x16x128xf32>
    %19 = vector.shape_cast %18 : vector<16x16x128xf32> to vector<256x128xf32>
    %20 = arith.truncf %19 : vector<256x128xf32> to vector<256x128xbf16>
    %c0_9 = arith.constant 0 : index
    %c512 = arith.constant 512 : index
    %21 = vector.load %arg7[%c0_9, %c512] : memref<256x1152xbf16, #tpu.memory_space<vmem>>, vector<256x128xbf16>
    tpu.vector_store %arg7[%c0_9, %c512], %20 {strides = array<i32>} : memref<256x1152xbf16, #tpu.memory_space<vmem>>, vector<256x128xbf16>,
    %22 = vector.extract_strided_slice %1 {offsets = [1, 2, 0], sizes = [16, 16, 128], strides = [1, 1, 1]} : vector<18x18x128xf32> to vector<16x16x128xf32>
    %23 = vector.shape_cast %22 : vector<16x16x128xf32> to vector<256x128xf32>
    %24 = arith.truncf %23 : vector<256x128xf32> to vector<256x128xbf16>
    %c0_10 = arith.constant 0 : index
    %c640 = arith.constant 640 : index
    %25 = vector.load %arg7[%c0_10, %c640] : memref<256x1152xbf16, #tpu.memory_space<vmem>>, vector<256x128xbf16>
    tpu.vector_store %arg7[%c0_10, %c640], %24 {strides = array<i32>} : memref<256x1152xbf16, #tpu.memory_space<vmem>>, vector<256x128xbf16>,
    %26 = vector.extract_strided_slice %1 {offsets = [2, 0, 0], sizes = [16, 16, 128], strides = [1, 1, 1]} : vector<18x18x128xf32> to vector<16x16x128xf32>
    %27 = vector.shape_cast %26 : vector<16x16x128xf32> to vector<256x128xf32>
    %28 = arith.truncf %27 : vector<256x128xf32> to vector<256x128xbf16>
    %c0_11 = arith.constant 0 : index
    %c768 = arith.constant 768 : index
    %29 = vector.load %arg7[%c0_11, %c768] : memref<256x1152xbf16, #tpu.memory_space<vmem>>, vector<256x128xbf16>
    tpu.vector_store %arg7[%c0_11, %c768], %28 {strides = array<i32>} : memref<256x1152xbf16, #tpu.memory_space<vmem>>, vector<256x128xbf16>,
    %30 = vector.extract_strided_slice %1 {offsets = [2, 1, 0], sizes = [16, 16, 128], strides = [1, 1, 1]} : vector<18x18x128xf32> to vector<16x16x128xf32>
    %31 = vector.shape_cast %30 : vector<16x16x128xf32> to vector<256x128xf32>
    %32 = arith.truncf %31 : vector<256x128xf32> to vector<256x128xbf16>
    %c0_12 = arith.constant 0 : index
    %c896 = arith.constant 896 : index
    %33 = vector.load %arg7[%c0_12, %c896] : memref<256x1152xbf16, #tpu.memory_space<vmem>>, vector<256x128xbf16>
    tpu.vector_store %arg7[%c0_12, %c896], %32 {strides = array<i32>} : memref<256x1152xbf16, #tpu.memory_space<vmem>>, vector<256x128xbf16>,
    %34 = vector.extract_strided_slice %1 {offsets = [2, 2, 0], sizes = [16, 16, 128], strides = [1, 1, 1]} : vector<18x18x128xf32> to vector<16x16x128xf32>
    %35 = vector.shape_cast %34 : vector<16x16x128xf32> to vector<256x128xf32>
    %36 = arith.truncf %35 : vector<256x128xf32> to vector<256x128xbf16>
    %c0_13 = arith.constant 0 : index
    %c1024 = arith.constant 1024 : index
    %37 = vector.load %arg7[%c0_13, %c1024] : memref<256x1152xbf16, #tpu.memory_space<vmem>>, vector<256x128xbf16>
    tpu.vector_store %arg7[%c0_13, %c1024], %36 {strides = array<i32>} : memref<256x1152xbf16, #tpu.memory_space<vmem>>, vector<256x128xbf16>,
    %c0_14 = arith.constant 0 : index
    %c0_15 = arith.constant 0 : index
    %38 = vector.load %arg7[%c0_14, %c0_15] : memref<256x1152xbf16, #tpu.memory_space<vmem>>, vector<256x1152xbf16>
    %c0_16 = arith.constant 0 : index
    %c0_17 = arith.constant 0 : index
    %39 = vector.load %arg3[%c0_16, %c0_17] : memref<1152x128xbf16, #tpu.memory_space<vmem>>, vector<1152x128xbf16>
    %cst = arith.constant dense<0.000000e+00> : vector<256x128xf32>
    %40 = tpu.matmul %38, %39, %cst {dimension_numbers = #tpu.dot_dimension_numbers<[1], [0], [0], [1], [0, 0, 1, 1], [], []>} : vector<256x1152xbf16>, vector<1152x128xbf16>, vector<256x128xf32> -> vector<256x128xf32>
    %41 = vector.shape_cast %40 : vector<256x128xf32> to vector<16x16x128xf32>
    %c0_18 = arith.constant 0 : index
    %c0_19 = arith.constant 0 : index
    %c0_20 = arith.constant 0 : index
    %c0_21 = arith.constant 0 : index
    %42 = vector.load %arg4[%c0_18, %c0_19, %c0_20, %c0_21] : memref<1x16x16x128xf32, #tpu.memory_space<vmem>>, vector<1x16x16x128xf32>
    %43 = vector.shape_cast %42 : vector<1x16x16x128xf32> to vector<16x16x128xf32>
    %44 = vector.shape_cast %41 : vector<16x16x128xf32> to vector<1x16x16x128xf32>
    tpu.vector_store %arg4[%c0_18, %c0_19, %c0_20, %c0_21], %44 {strides = array<i32>} : memref<1x16x16x128xf32, #tpu.memory_space<vmem>>, vector<1x16x16x128xf32>,
    %45 = vector.shape_cast %40 : vector<256x128xf32> to vector<32x8x128xf32>
    %cst_22 = arith.constant dense<0.000000e+00> : vector<8x128xf32>
    %46 = vector.multi_reduction <add>, %45, %cst_22 [0] : vector<32x8x128xf32> to vector<8x128xf32>
    %c0_23 = arith.constant 0 : index
    %c0_24 = arith.constant 0 : index
    %c0_25 = arith.constant 0 : index
    %c0_26 = arith.constant 0 : index
    %47 = vector.load %arg5[%c0_23, %c0_24, %c0_25, %c0_26] : memref<1x1x8x128xf32, #tpu.memory_space<vmem>>, vector<1x1x8x128xf32>
    %48 = vector.shape_cast %47 : vector<1x1x8x128xf32> to vector<8x128xf32>
    %49 = vector.shape_cast %46 : vector<8x128xf32> to vector<1x1x8x128xf32>
    tpu.vector_store %arg5[%c0_23, %c0_24, %c0_25, %c0_26], %49 {strides = array<i32>} : memref<1x1x8x128xf32, #tpu.memory_space<vmem>>, vector<1x1x8x128xf32>,
    %50 = arith.mulf %40, %40 : vector<256x128xf32>
    %51 = vector.shape_cast %50 : vector<256x128xf32> to vector<32x8x128xf32>
    %cst_27 = arith.constant dense<0.000000e+00> : vector<8x128xf32>
    %52 = vector.multi_reduction <add>, %51, %cst_27 [0] : vector<32x8x128xf32> to vector<8x128xf32>
    %c0_28 = arith.constant 0 : index
    %c0_29 = arith.constant 0 : index
    %c0_30 = arith.constant 0 : index
    %c0_31 = arith.constant 0 : index
    %53 = vector.load %arg6[%c0_28, %c0_29, %c0_30, %c0_31] : memref<1x1x8x128xf32, #tpu.memory_space<vmem>>, vector<1x1x8x128xf32>
    %54 = vector.shape_cast %53 : vector<1x1x8x128xf32> to vector<8x128xf32>
    %55 = vector.shape_cast %52 : vector<8x128xf32> to vector<1x1x8x128xf32>
    tpu.vector_store %arg6[%c0_28, %c0_29, %c0_30, %c0_31], %55 {strides = array<i32>} : memref<1x1x8x128xf32, #tpu.memory_space<vmem>>, vector<1x1x8x128xf32>,
    return
  }
  func.func @transform_0(%arg0: i32, %arg1: i32) -> (i32, i32, i32, i32, i32) {
    %c0_i32 = arith.constant 0 : i32
    %c0_i32_0 = arith.constant 0 : i32
    %c0_i32_1 = arith.constant 0 : i32
    %c0_i32_2 = arith.constant 0 : i32
    return %arg0, %arg1, %c0_i32, %c0_i32_0, %c0_i32_1 : i32, i32, i32, i32, i32
  }
  func.func @transform_1(%arg0: i32, %arg1: i32) -> (i32, i32) {
    %c0_i32 = arith.constant 0 : i32
    %c0_i32_0 = arith.constant 0 : i32
    %c0_i32_1 = arith.constant 0 : i32
    return %c0_i32, %c0_i32_0 : i32, i32
  }
  func.func @transform_2(%arg0: i32, %arg1: i32) -> (i32, i32, i32, i32) {
    %c0_i32 = arith.constant 0 : i32
    %c0_i32_0 = arith.constant 0 : i32
    %c0_i32_1 = arith.constant 0 : i32
    return %arg0, %arg1, %c0_i32, %c0_i32_0 : i32, i32, i32, i32
  }
  func.func @transform_3(%arg0: i32, %arg1: i32) -> (i32, i32, i32, i32) {
    %c0_i32 = arith.constant 0 : i32
    %c0_i32_0 = arith.constant 0 : i32
    %c0_i32_1 = arith.constant 0 : i32
    return %arg0, %arg1, %c0_i32, %c0_i32_0 : i32, i32, i32, i32
  }
  func.func @transform_4(%arg0: i32, %arg1: i32) -> (i32, i32, i32, i32) {
    %c0_i32 = arith.constant 0 : i32
    %c0_i32_0 = arith.constant 0 : i32
    %c0_i32_1 = arith.constant 0 : i32
    return %arg0, %arg1, %c0_i32, %c0_i32_0 : i32, i32, i32, i32
  }
}

module attributes {stable_mosaic.version = 11 : i64} {
  func.func @affine_relu_kernel(%arg0: i32, %arg1: i32, %arg2: memref<1x16x16x128xf32, #tpu.memory_space<vmem>>, %arg3: memref<1x128xf32, #tpu.memory_space<vmem>>, %arg4: memref<1x128xf32, #tpu.memory_space<vmem>>, %arg5: memref<1x16x16x128xf32, #tpu.memory_space<vmem>>) attributes {dimension_semantics = [#tpu.dimension_semantics<parallel>, #tpu.dimension_semantics<parallel>], iteration_bounds = array<i64: 2, 1>, scalar_prefetch = 0 : i64, scratch_operands = 0 : i64, tpu.core_type = #tpu.core_type<tc>, window_params = [{transform_indices = @transform_0, window_bounds = array<i64: 1, 16, 16, 128>}, {pipeline_mode = #tpu.pipeline_mode<synchronous>, transform_indices = @transform_1, window_bounds = array<i64: 1, 128>}, {pipeline_mode = #tpu.pipeline_mode<synchronous>, transform_indices = @transform_2, window_bounds = array<i64: 1, 128>}, {transform_indices = @transform_3, window_bounds = array<i64: 1, 16, 16, 128>}]} {
    %c0 = arith.constant 0 : index
    %c0_0 = arith.constant 0 : index
    %0 = vector.load %arg3[%c0, %c0_0] : memref<1x128xf32, #tpu.memory_space<vmem>>, vector<1x128xf32>
    %1 = vector.shape_cast %0 : vector<1x128xf32> to vector<1x1x128xf32>
    %c0_1 = arith.constant 0 : index
    %c0_2 = arith.constant 0 : index
    %2 = vector.load %arg4[%c0_1, %c0_2] : memref<1x128xf32, #tpu.memory_space<vmem>>, vector<1x128xf32>
    %3 = vector.shape_cast %2 : vector<1x128xf32> to vector<1x1x128xf32>
    %c0_3 = arith.constant 0 : index
    %c0_4 = arith.constant 0 : index
    %c0_5 = arith.constant 0 : index
    %c0_6 = arith.constant 0 : index
    %4 = vector.load %arg2[%c0_3, %c0_4, %c0_5, %c0_6] : memref<1x16x16x128xf32, #tpu.memory_space<vmem>>, vector<1x16x16x128xf32>
    %5 = vector.shape_cast %4 : vector<1x16x16x128xf32> to vector<16x16x128xf32>
    %6 = vector.broadcast %1 : vector<1x1x128xf32> to vector<16x16x128xf32>
    %7 = arith.mulf %5, %6 : vector<16x16x128xf32>
    %8 = vector.broadcast %3 : vector<1x1x128xf32> to vector<16x16x128xf32>
    %9 = arith.addf %7, %8 : vector<16x16x128xf32>
    %cst = arith.constant 0.000000e+00 : f32
    %10 = vector.broadcast %cst : f32 to vector<16x16x128xf32>
    %11 = arith.maximumf %9, %10 : vector<16x16x128xf32>
    %c0_7 = arith.constant 0 : index
    %c0_8 = arith.constant 0 : index
    %c0_9 = arith.constant 0 : index
    %c0_10 = arith.constant 0 : index
    %12 = vector.load %arg5[%c0_7, %c0_8, %c0_9, %c0_10] : memref<1x16x16x128xf32, #tpu.memory_space<vmem>>, vector<1x16x16x128xf32>
    %13 = vector.shape_cast %12 : vector<1x16x16x128xf32> to vector<16x16x128xf32>
    %14 = vector.shape_cast %11 : vector<16x16x128xf32> to vector<1x16x16x128xf32>
    tpu.vector_store %arg5[%c0_7, %c0_8, %c0_9, %c0_10], %14 {strides = array<i32>} : memref<1x16x16x128xf32, #tpu.memory_space<vmem>>, vector<1x16x16x128xf32>,
    return
  }
  func.func @transform_0(%arg0: i32, %arg1: i32) -> (i32, i32, i32, i32) {
    %c0_i32 = arith.constant 0 : i32
    %c0_i32_0 = arith.constant 0 : i32
    %c0_i32_1 = arith.constant 0 : i32
    return %arg0, %arg1, %c0_i32, %c0_i32_0 : i32, i32, i32, i32
  }
  func.func @transform_1(%arg0: i32, %arg1: i32) -> (i32, i32) {
    %c0_i32 = arith.constant 0 : i32
    %c0_i32_0 = arith.constant 0 : i32
    %c0_i32_1 = arith.constant 0 : i32
    return %c0_i32, %c0_i32_0 : i32, i32
  }
  func.func @transform_2(%arg0: i32, %arg1: i32) -> (i32, i32) {
    %c0_i32 = arith.constant 0 : i32
    %c0_i32_0 = arith.constant 0 : i32
    %c0_i32_1 = arith.constant 0 : i32
    return %c0_i32, %c0_i32_0 : i32, i32
  }
  func.func @transform_3(%arg0: i32, %arg1: i32) -> (i32, i32, i32, i32) {
    %c0_i32 = arith.constant 0 : i32
    %c0_i32_0 = arith.constant 0 : i32
    %c0_i32_1 = arith.constant 0 : i32
    return %arg0, %arg1, %c0_i32, %c0_i32_0 : i32, i32, i32, i32
  }
}

</mosaic_0001>

<bundles_post_ra>
// kernel: double_conv.5
= control target key start
LH: loop header
LB: loop body
LE: loop exit
PB: predicated region body
PF: predicated region fallthrough
CT: control target
= control target key end

     0   :  { %s568_s12 = smov 0   ;;  %s570_s13 = smov 0   ;;  %s743_s0 = inlined_call_operand.vmem [shape: f32[2,16,16,128], index: 0, kind: input, shape index: {}]   ;;  %s744_s1 = inlined_call_operand.vmem [shape: f32[1,128], index: 1, kind: input, shape index: {}]   ;;  %s745_s2 = inlined_call_operand.vmem [shape: f32[1,128], index: 2, kind: input, shape index: {}]   ;;  %s746_s3 = inlined_call_operand.vmem [shape: f32[2,16,16,128], index: 3, kind: output, shape index: {}]  }
   0x1   :  { %s572_s14 = smov 0  }
   0x2 LB: > { %s25_s15 = sadd.s32 1, %s542_s13  ;;  %p489_p0 = scmp.ge.s32.totalorder %s546_s14, 1  ;;  %s546_s14 = sphi %s572_s14, %s13_s14   ;;  %s542_s13 = sphi %s570_s13, %s748_s13   ;;  %s538_s12 = sphi %s568_s12, %s747_s12  }
   0x3   : > { %p27_p1 = scmp.ge.s32.totalorder %s25_s15, 2  ;;  %p159_p2 = scmp.lt.s32.totalorder %s546_s14, 3 }
   0x5   : > { %s750_s15 = smov (%p27_p1, %s25_s15), 0  ;;  %p160_p3 = pnand %p489_p0, %p159_p2 }
   0x6   : > { %p194_p4 = scmp.lt.s32.totalorder (!%p160_p3), %s538_s12, 1  ;;  %v589_v0 = vld [vmem:[%s744_s1] ss:$0 sm:$0xff] (!%p160_p3) }
   0x7   : > { %163 = sbr.rel (%p160_p3) target bundleno = 47 (0x2f), region = 32  ;;  %v599_v1 = vld [vmem:[%s745_s2] ss:$0 sm:$0xff] (!%p160_p3) }
   0xe   : > { %s752_s12 = smov (!%p194_p4, %s538_s12), 1 }
   0xf   : > { %s498_s16 = sshll.u32 %s752_s12, 8 }
  0x10   : > { %s594_s21 = scalar_lea.vmem %s743_s0, %s498_s16  ;;  %s622_s26 = scalar_lea.vmem %s746_s3, %s498_s16 }
  0x11   : > { %v217_v2 = vld [vmem:[%s594_s21] sm:$0xff]  ;;  %v218_v3 = vld [vmem:[%s594_s21 + $0x8] sm:$0xff]  ;;  %v219_v4 = vld [vmem:[%s594_s21 + $0x10] sm:$0xff] }
  0x12   : > { %v255_v5 = vmul.f32 %v589_v0, %v217_v2  ;;  %v256_v6 = vmul.f32 %v589_v0, %v218_v3  ;;  %v257_v7 = vmul.f32 %v589_v0, %v219_v4  ;;  %v220_v8 = vld [vmem:[%s594_s21 + $0x18] sm:$0xff]  ;;  %v221_v9 = vld [vmem:[%s594_s21 + $0x20] sm:$0xff]  ;;  %v222_v10 = vld [vmem:[%s594_s21 + $0x28] sm:$0xff] }
  0x13   : > { %v258_v11 = vmul.f32 %v589_v0, %v220_v8  ;;  %v259_v12 = vmul.f32 %v589_v0, %v221_v9  ;;  %v260_v13 = vmul.f32 %v589_v0, %v222_v10  ;;  %v223_v14 = vld [vmem:[%s594_s21 + $0x30] sm:$0xff]  ;;  %v224_v15 = vld [vmem:[%s594_s21 + $0x38] sm:$0xff]  ;;  %v225_v24 = vld [vmem:[%s594_s21 + $0x40] sm:$0xff] }
  0x14   : > { %v293_v16 = vadd.f32 %v599_v1, %v255_v5  ;;  %v294_v17 = vadd.f32 %v599_v1, %v256_v6  ;;  %v295_v18 = vadd.f32 %v599_v1, %v257_v7  ;;  %v261_v19 = vmul.f32 %v589_v0, %v223_v14  ;;  %v226_v25 = vld [vmem:[%s594_s21 + $0x48] sm:$0xff]  ;;  %v227_v26 = vld [vmem:[%s594_s21 + $0x50] sm:$0xff]  ;;  %v228_v31 = vld [vmem:[%s594_s21 + $0x58] sm:$0xff] }
  0x15   : > { %v296_v20 = vadd.f32 %v599_v1, %v258_v11  ;;  %v297_v21 = vadd.f32 %v599_v1, %v259_v12  ;;  %v298_v22 = vadd.f32 %v599_v1, %v260_v13  ;;  %v262_v23 = vmul.f32 %v589_v0, %v224_v15  ;;  %v229_v32 = vld [vmem:[%s594_s21 + $0x60] sm:$0xff]  ;;  %v230_v33 = vld [vmem:[%s594_s21 + $0x68] sm:$0xff]  ;;  %v231_v38 = vld [vmem:[%s594_s21 + $0x70] sm:$0xff] }
  0x16   : > { %v325_v27 = vmax.f32 %v293_v16, 0.0  ;;  %v326_v28 = vmax.f32 %v294_v17, 0.0  ;;  %v327_v29 = vmax.f32 %v295_v18, 0.0  ;;  %v299_v30 = vadd.f32 %v599_v1, %v261_v19  ;;  %v232_v43 = vld [vmem:[%s594_s21 + $0x78] sm:$0xff]  ;;  %v233_v56 = vld [vmem:[%s594_s21 + $0x80] sm:$0xff]  ;;  %v234_v57 = vld [vmem:[%s594_s21 + $0x88] sm:$0xff] }
  0x17   : > { %v328_v34 = vmax.f32 %v296_v20, 0.0  ;;  %v329_v35 = vmax.f32 %v297_v21, 0.0  ;;  %v330_v36 = vmax.f32 %v298_v22, 0.0  ;;  %v300_v37 = vadd.f32 %v599_v1, %v262_v23  ;;  %v235_v58 = vld [vmem:[%s594_s21 + $0x90] sm:$0xff]  ;;  %v236_v63 = vld [vmem:[%s594_s21 + $0x98] sm:$0xff]  ;;  %v237_v2 = vld [vmem:[%s594_s21 + $0xa0] sm:$0xff] }
  0x18   : > { %357 = vst [vmem:[%s622_s26] sm:$0xff] %v325_v27  ;;  %358 = vst [vmem:[%s622_s26 + $0x8] sm:$0xff] %v326_v28  ;;  %v331_v39 = vmax.f32 %v299_v30, 0.0  ;;  %v263_v40 = vmul.f32 %v589_v0, %v225_v24  ;;  %v264_v41 = vmul.f32 %v589_v0, %v226_v25  ;;  %v265_v42 = vmul.f32 %v589_v0, %v227_v26  ;;  %v238_v3 = vld [vmem:[%s594_s21 + $0xa8] sm:$0xff]  ;;  %v239_v8 = vld [vmem:[%s594_s21 + $0xb0] sm:$0xff] }
  0x19   : > { %359 = vst [vmem:[%s622_s26 + $0x10] sm:$0xff] %v327_v29  ;;  %360 = vst [vmem:[%s622_s26 + $0x18] sm:$0xff] %v328_v34  ;;  %v332_v44 = vmax.f32 %v300_v37, 0.0  ;;  %v266_v45 = vmul.f32 %v589_v0, %v228_v31  ;;  %v267_v46 = vmul.f32 %v589_v0, %v229_v32  ;;  %v268_v47 = vmul.f32 %v589_v0, %v230_v33  ;;  %v240_v13 = vld [vmem:[%s594_s21 + $0xb8] sm:$0xff]  ;;  %v241_v26 = vld [vmem:[%s594_s21 + $0xc0] sm:$0xff] }
  0x1a   : > { %361 = vst [vmem:[%s622_s26 + $0x20] sm:$0xff] %v329_v35  ;;  %362 = vst [vmem:[%s622_s26 + $0x28] sm:$0xff] %v330_v36  ;;  %v301_v48 = vadd.f32 %v599_v1, %v263_v40  ;;  %v302_v49 = vadd.f32 %v599_v1, %v264_v41  ;;  %v303_v50 = vadd.f32 %v599_v1, %v265_v42  ;;  %v242_v27 = vld [vmem:[%s594_s21 + $0xc8] sm:$0xff]  ;;  %v243_v28 = vld [vmem:[%s594_s21 + $0xd0] sm:$0xff] }
  0x1b   : > { %363 = vst [vmem:[%s622_s26 + $0x30] sm:$0xff] %v331_v39  ;;  %v269_v51 = vmul.f32 %v589_v0, %v231_v38  ;;  %364 = vst [vmem:[%s622_s26 + $0x38] sm:$0xff] %v332_v44  ;;  %v304_v52 = vadd.f32 %v599_v1, %v266_v45  ;;  %v305_v53 = vadd.f32 %v599_v1, %v267_v46  ;;  %v244_v33 = vld [vmem:[%s594_s21 + $0xd8] sm:$0xff]  ;;  %v245_v34 = vld [vmem:[%s594_s21 + $0xe0] sm:$0xff] }
  0x1c   : > { %v306_v54 = vadd.f32 %v599_v1, %v268_v47  ;;  %v270_v55 = vmul.f32 %v589_v0, %v232_v43  ;;  %v333_v59 = vmax.f32 %v301_v48, 0.0  ;;  %v334_v60 = vmax.f32 %v302_v49, 0.0  ;;  %v246_v35 = vld [vmem:[%s594_s21 + $0xe8] sm:$0xff]  ;;  %v247_v40 = vld [vmem:[%s594_s21 + $0xf0] sm:$0xff]  ;;  %v248_v45 = vld [vmem:[%s594_s21 + $0xf8] sm:$0xff] }
  0x1d   : > { %v335_v61 = vmax.f32 %v303_v50, 0.0  ;;  %v307_v62 = vadd.f32 %v599_v1, %v269_v51  ;;  %v336_v4 = vmax.f32 %v304_v52, 0.0  ;;  %v337_v5 = vmax.f32 %v305_v53, 0.0 }
  0x1e   : > { %v338_v6 = vmax.f32 %v306_v54, 0.0  ;;  %v308_v7 = vadd.f32 %v599_v1, %v270_v55  ;;  %365 = vst [vmem:[%s622_s26 + $0x40] sm:$0xff] %v333_v59  ;;  %366 = vst [vmem:[%s622_s26 + $0x48] sm:$0xff] %v334_v60  ;;  %v271_v10 = vmul.f32 %v589_v0, %v233_v56  ;;  %v272_v11 = vmul.f32 %v589_v0, %v234_v57 }
  0x1f   : > { %367 = vst [vmem:[%s622_s26 + $0x50] sm:$0xff] %v335_v61  ;;  %v339_v9 = vmax.f32 %v307_v62, 0.0  ;;  %v273_v12 = vmul.f32 %v589_v0, %v235_v58  ;;  %368 = vst [vmem:[%s622_s26 + $0x58] sm:$0xff] %v336_v4  ;;  %v274_v15 = vmul.f32 %v589_v0, %v236_v63  ;;  %v275_v16 = vmul.f32 %v589_v0, %v237_v2 }
  0x20   : > { %369 = vst [vmem:[%s622_s26 + $0x60] sm:$0xff] %v337_v5  ;;  %370 = vst [vmem:[%s622_s26 + $0x68] sm:$0xff] %v338_v6  ;;  %v340_v14 = vmax.f32 %v308_v7, 0.0  ;;  %v276_v17 = vmul.f32 %v589_v0, %v238_v3  ;;  %v309_v18 = vadd.f32 %v599_v1, %v271_v10  ;;  %v310_v19 = vadd.f32 %v599_v1, %v272_v11 }
  0x21   : > { %371 = vst [vmem:[%s622_s26 + $0x70] sm:$0xff] %v339_v9  ;;  %v311_v20 = vadd.f32 %v599_v1, %v273_v12  ;;  %v277_v21 = vmul.f32 %v589_v0, %v239_v8  ;;  %v312_v22 = vadd.f32 %v599_v1, %v274_v15  ;;  %v313_v23 = vadd.f32 %v599_v1, %v275_v16 }
  0x22   : > { %372 = vst [vmem:[%s622_s26 + $0x78] sm:$0xff] %v340_v14  ;;  %v314_v24 = vadd.f32 %v599_v1, %v276_v17  ;;  %v278_v25 = vmul.f32 %v589_v0, %v240_v13  ;;  %v341_v29 = vmax.f32 %v309_v18, 0.0  ;;  %v342_v30 = vmax.f32 %v310_v19, 0.0 }
  0x23   : > { %v343_v31 = vmax.f32 %v311_v20, 0.0  ;;  %v315_v32 = vadd.f32 %v599_v1, %v277_v21  ;;  %v344_v36 = vmax.f32 %v312_v22, 0.0  ;;  %v345_v37 = vmax.f32 %v313_v23, 0.0 }
  0x24   : > { %v346_v38 = vmax.f32 %v314_v24, 0.0  ;;  %v316_v39 = vadd.f32 %v599_v1, %v278_v25  ;;  %373 = vst [vmem:[%s622_s26 + $0x80] sm:$0xff] %v341_v29  ;;  %374 = vst [vmem:[%s622_s26 + $0x88] sm:$0xff] %v342_v30  ;;  %v279_v42 = vmul.f32 %v589_v0, %v241_v26  ;;  %v280_v43 = vmul.f32 %v589_v0, %v242_v27 }
  0x25   : > { %375 = vst [vmem:[%s622_s26 + $0x90] sm:$0xff] %v343_v31  ;;  %v347_v41 = vmax.f32 %v315_v32, 0.0  ;;  %v281_v44 = vmul.f32 %v589_v0, %v243_v28  ;;  %376 = vst [vmem:[%s622_s26 + $0x98] sm:$0xff] %v344_v36  ;;  %v282_v47 = vmul.f32 %v589_v0, %v244_v33  ;;  %v283_v48 = vmul.f32 %v589_v0, %v245_v34 }
  0x26   : > { %377 = vst [vmem:[%s622_s26 + $0xa0] sm:$0xff] %v345_v37  ;;  %378 = vst [vmem:[%s622_s26 + $0xa8] sm:$0xff] %v346_v38  ;;  %v348_v46 = vmax.f32 %v316_v39, 0.0  ;;  %v284_v49 = vmul.f32 %v589_v0, %v246_v35  ;;  %v317_v50 = vadd.f32 %v599_v1, %v279_v42  ;;  %v318_v51 = vadd.f32 %v599_v1, %v280_v43 }
  0x27   : > { %379 = vst [vmem:[%s622_s26 + $0xb0] sm:$0xff] %v347_v41  ;;  %v319_v52 = vadd.f32 %v599_v1, %v281_v44  ;;  %v285_v53 = vmul.f32 %v589_v0, %v247_v40  ;;  %v320_v54 = vadd.f32 %v599_v1, %v282_v47  ;;  %v321_v55 = vadd.f32 %v599_v1, %v283_v48 }
  0x28   : > { %380 = vst [vmem:[%s622_s26 + $0xb8] sm:$0xff] %v348_v46  ;;  %v322_v56 = vadd.f32 %v599_v1, %v284_v49  ;;  %v286_v57 = vmul.f32 %v589_v0, %v248_v45  ;;  %v349_v58 = vmax.f32 %v317_v50, 0.0  ;;  %v350_v59 = vmax.f32 %v318_v51, 0.0 }
  0x29   : > { %v351_v60 = vmax.f32 %v319_v52, 0.0  ;;  %v323_v61 = vadd.f32 %v599_v1, %v285_v53  ;;  %v352_v62 = vmax.f32 %v320_v54, 0.0  ;;  %v353_v63 = vmax.f32 %v321_v55, 0.0 }
  0x2a   : > { %v354_v2 = vmax.f32 %v322_v56, 0.0  ;;  %v324_v3 = vadd.f32 %v599_v1, %v286_v57  ;;  %381 = vst [vmem:[%s622_s26 + $0xc0] sm:$0xff] %v349_v58  ;;  %382 = vst [vmem:[%s622_s26 + $0xc8] sm:$0xff] %v350_v59 }
  0x2b   : > { %383 = vst [vmem:[%s622_s26 + $0xd0] sm:$0xff] %v351_v60  ;;  %v355_v4 = vmax.f32 %v323_v61, 0.0  ;;  %384 = vst [vmem:[%s622_s26 + $0xd8] sm:$0xff] %v352_v62 }
  0x2c   : > { %385 = vst [vmem:[%s622_s26 + $0xe0] sm:$0xff] %v353_v63  ;;  %386 = vst [vmem:[%s622_s26 + $0xe8] sm:$0xff] %v354_v2  ;;  %v356_v0 = vmax.f32 %v324_v3, 0.0 }
  0x2d   : > { %387 = vst [vmem:[%s622_s26 + $0xf0] sm:$0xff] %v355_v4 }
  0x2e   : > { %388 = vst [vmem:[%s622_s26 + $0xf8] sm:$0xff] %v356_v0 }
  0x2f PF: > { %s13_s14 = sadd.s32 1, %s546_s14   ;;  %s747_s12 = smov %s542_s13 }
  0x30   : > { %p10_p5 = scmp.ge.s32.totalorder %s13_s14, 4   ;;  %s748_s13 = smov %s750_s15 }
  0x32   :  { %12 = sbr.rel (!%p10_p5) target bundleno = 2 (0x2), region = 62 }

// kernel: double_conv.4
= control target key start
LH: loop header
LB: loop body
LE: loop exit
PB: predicated region body
PF: predicated region fallthrough
CT: control target
= control target key end

     0   :  { %s3433_s15 = smov 0   ;;  %s3435_s16 = smov 0   ;;  %s4691_s0 = inlined_call_operand.vmem [shape: f32[2,1,18,18,128], index: 0, kind: input, shape index: {}]   ;;  %s4692_s1 = inlined_call_operand.vmem [shape: bf16[1152,128], index: 1, kind: input, shape index: {}]   ;;  %s4693_s2 = inlined_call_operand.vmem [shape: f32[2,16,16,128], index: 2, kind: output, shape index: {0}]   ;;  %s4694_s3 = inlined_call_operand.vmem [shape: f32[2,1,8,128], index: 3, kind: output, shape index: {1}]   ;;  %s4695_s4 = inlined_call_operand.vmem [shape: f32[2,1,8,128], index: 4, kind: output, shape index: {2}]  }
   0x1   :  { %s3437_s17 = smov 0  }
   0x2 LB: > { %s27_s18 = sadd.s32 1, %s3402_s16  ;;  %p2670_p0 = scmp.ge.s32.totalorder %s3406_s17, 1  ;;  %s3406_s17 = sphi %s3437_s17, %s15_s17   ;;  %s3402_s16 = sphi %s3435_s16, %s4707_s16   ;;  %s3398_s15 = sphi %s3433_s15, %s4706_s15  }
   0x3   : > { %p29_p1 = scmp.ge.s32.totalorder %s27_s18, 2  ;;  %p191_p2 = scmp.lt.s32.totalorder %s3406_s17, 3 }
   0x5   : > { %s4709_s18 = smov (%p29_p1, %s27_s18), 0  ;;  %p192_p3 = pnand %p2670_p0, %p191_p2 }
   0x7   : > { %195 = sbr.rel (%p192_p3) target bundleno = 554 (0x22a), region = 28 }
   0xe   : > { %v3312_v0 = vld [vmem:[%s4692_s1 + $0x40] sm:$0xff]   ;;  %p240_p4 = scmp.lt.s32.totalorder %s3398_s15, 1  ;;  %v3314_v2 = vld [vmem:[%s4692_s1 + $0x48] sm:$0xff]   ;;  %v3316_v4 = vld [vmem:[%s4692_s1 + $0x50] sm:$0xff]   ;;  %vm409_vm0 = vcmask 1046528   ;;  %vm554_vm1 = vcmask 1045504  }
   0xf   : > { %v3313_v1 = vld [vmem:[%s4692_s1] sm:$0xff]   ;;  %2751 = vmatprep.subr.bf16.mxu0 %v3312_v0  ;;  %3271 = vmatprep.subr.bf16.mxu1 %v3312_v0  ;;  %v3315_v3 = vld [vmem:[%s4692_s1 + $0x8] sm:$0xff]   ;;  %v3317_v5 = vld [vmem:[%s4692_s1 + $0x10] sm:$0xff]  }
  0x10   : > { %2752 = vmatpush3.bf16.msra.mxu0 %v3313_v1  ;;  %3279 = vmatpush3.bf16.msra.mxu1 %v3313_v1  ;;  %s4711_s15 = smov (!%p240_p4, %s3398_s15), 1  ;;  %v3318_v6 = vld [vmem:[%s4692_s1 + $0x58] sm:$0xff]   ;;  %v3320_v8 = vld [vmem:[%s4692_s1 + $0x60] sm:$0xff]   ;;  %v3322_v10 = vld [vmem:[%s4692_s1 + $0x68] sm:$0xff]  }
  0x11   : > { %2753 = vmatprep.subr.bf16.mxu0 %v3314_v2  ;;  %3272 = vmatprep.subr.bf16.mxu1 %v3314_v2  ;;  %s3287_s7 = smul.u32 432, %s4711_s15  ;;  %v3319_v7 = vld [vmem:[%s4692_s1 + $0x18] sm:$0xff]   ;;  %v3321_v9 = vld [vmem:[%s4692_s1 + $0x20] sm:$0xff]   ;;  %v3323_v22 = vld [vmem:[%s4692_s1 + $0x28] sm:$0xff]   ;;  %s2674_s22 = sshll.u32 %s4711_s15, 3 }
  0x12   : > { %v3324_v26 = vld [vmem:[%s4692_s1 + $0x70] sm:$0xff]   ;;  %v3326_v32 = vld [vmem:[%s4692_s1 + $0x78] sm:$0xff]   ;;  %v3328_v37 = vld [vmem:[%s4692_s1 + $0xc0] sm:$0xff]   ;;  %s266_s25 = scalar_lea.vmem %s4694_s3, %s2674_s22  ;;  %s273_s28 = scalar_lea.vmem %s4695_s4, %s2674_s22 }
  0x13   : > { %s3484_s14 = scalar_lea.vmem %s4691_s0, %s3287_s7  ;;  %v3325_v31 = vld [vmem:[%s4692_s1 + $0x30] sm:$0xff]   ;;  %v3327_v33 = vld [vmem:[%s4692_s1 + $0x38] sm:$0xff]   ;;  %v3329_v46 = vld [vmem:[%s4692_s1 + $0x140] sm:$0xff]  }
  0x14   : > { %2754 = vmatpush3.bf16.msra.mxu0 %v3315_v3  ;;  %3280 = vmatpush3.bf16.msra.mxu1 %v3315_v3  ;;  %v3493_v11 = vld [vmem:[%s3484_s14] sm:$0xff]  ;;  %v3496_v12 = vld [vmem:[%s3484_s14 + $0x8] sm:$0xff]  ;;  %v3499_v13 = vld [vmem:[%s3484_s14 + $0x10] sm:$0x3] }
  0x15   : > { %2755 = vmatprep.subr.bf16.mxu0 %v3316_v4  ;;  %3273 = vmatprep.subr.bf16.mxu1 %v3316_v4  ;;  %v410_v14 = vrot.slane %v3493_v11, 1  ;;  %v411_v15 = vrot.slane %v3496_v12, 1  ;;  %v413_v16 = vrot.slane %v3499_v13, 1  ;;  %v3505_v17 = vld [vmem:[%s3484_s14 + $0x120] sm:$0xff]  ;;  %v3508_v18 = vld [vmem:[%s3484_s14 + $0x128] sm:$0xff]  ;;  %v3539_v34 = vld [vmem:[%s3484_s14 + $0x18] sm:$0xff]  ;;  %v329_v50 = vpack.c.bf16 %v3496_v12, %v3493_v11 }
  0x16   : > { %v3511_v19 = vld [vmem:[%s3484_s14 + $0x130] sm:$0x3]  ;;  %v470_v20 = vrot.slane %v3505_v17, 1  ;;  %v471_v21 = vrot.slane %v3508_v18, 1  ;;  %v3542_v35 = vld [vmem:[%s3484_s14 + $0x20] sm:$0xff]  ;;  %v415_v38 = vrot.slane %v3539_v34, 1  ;;  %v3574_v51 = vpack.c.bf16 %v3508_v18, %v3505_v17 }
  0x17   : > { %v412_v23 = vsel %vm409_vm0, %v410_v14, %v411_v15  ;;  %v414_v24 = vsel %vm409_vm0, %v411_v15, %v413_v16  ;;  %v473_v25 = vrot.slane %v3511_v19, 1  ;;  %v3545_v36 = vld [vmem:[%s3484_s14 + $0x28] sm:$0x3]  ;;  %v416_v39 = vrot.slane %v3542_v35, 1  ;;  %v3554_v41 = vld [vmem:[%s3484_s14 + $0x138] sm:$0xff]  ;;  %v3557_v42 = vld [vmem:[%s3484_s14 + $0x140] sm:$0xff] }
  0x18   : > { %2756 = vmatpush3.bf16.msra.mxu0 %v3317_v5  ;;  %3281 = vmatpush3.bf16.msra.mxu1 %v3317_v5  ;;  %v522_v27 = vpack.c.bf16 %v414_v24, %v412_v23  ;;  %v472_v28 = vsel %vm409_vm0, %v470_v20, %v471_v21  ;;  %v418_v40 = vrot.slane %v3545_v36, 1  ;;  %v3560_v43 = vld [vmem:[%s3484_s14 + $0x148] sm:$0x3]  ;;  %v475_v44 = vrot.slane %v3554_v41, 1  ;;  %v3330_v52 = vld [vmem:[%s4692_s1 + $0x80] sm:$0xff]   ;;  %v3598_v61 = vld [vmem:[%s3484_s14 + $0x30] sm:$0xff] }
  0x19   : > { %2757 = vmatprep.subr.bf16.mxu0 %v3318_v6  ;;  %3274 = vmatprep.subr.bf16.mxu1 %v3318_v6  ;;  %v474_v29 = vsel %vm409_vm0, %v471_v21, %v473_v25  ;;  %v476_v45 = vrot.slane %v3557_v42, 1  ;;  %v478_v47 = vrot.slane %v3560_v43, 1  ;;  %v417_v48 = vsel %vm409_vm0, %v415_v38, %v416_v39  ;;  %v3331_v55 = vld [vmem:[%s4692_s1 + $0x100] sm:$0xff]   ;;  %v3332_v56 = vld [vmem:[%s4692_s1 + $0xc8] sm:$0xff]   ;;  %v3601_v62 = vld [vmem:[%s3484_s14 + $0x38] sm:$0xff] }
  0x1a   : > { %1587 = vmatprep.mubr.bf16.mxu0 %v522_v27  ;;  %v3526_v30 = vpack.c.bf16 %v474_v29, %v472_v28  ;;  %v419_v49 = vsel %vm409_vm0, %v416_v39, %v418_v40  ;;  %v3333_v58 = vld [vmem:[%s4692_s1 + $0x88] sm:$0xff]   ;;  %v615_v63 = vrot.slane %v3505_v17, 2  ;;  %v616_v0 = vrot.slane %v3508_v18, 2  ;;  %v3608_v2 = vld [vmem:[%s3484_s14 + $0x40] sm:$0x3]  ;;  %v3613_v5 = vld [vmem:[%s3484_s14 + $0x150] sm:$0xff] }
  0x1b   : > { %v477_v53 = vsel %vm409_vm0, %v475_v44, %v476_v45  ;;  %v479_v54 = vsel %vm409_vm0, %v476_v45, %v478_v47  ;;  %v3587_v57 = vpack.c.bf16 %v419_v49, %v417_v48  ;;  %v3337_v60 = vld [vmem:[%s4692_s1 + $0x148] sm:$0xff]   ;;  %v618_v1 = vrot.slane %v3511_v19, 2  ;;  %v3616_v6 = vld [vmem:[%s3484_s14 + $0x158] sm:$0xff]  ;;  %v3334_v15 = vld [vmem:[%s4692_s1 + $0xd0] sm:$0xff]  }
  0x1c   : > { %2758 = vmatpush3.bf16.msra.mxu0 %v3319_v7  ;;  %3282 = vmatpush3.bf16.msra.mxu1 %v3319_v7  ;;  %v3592_v59 = vpack.c.bf16 %v479_v54, %v477_v53  ;;  %v420_v3 = vrot.slane %v3598_v61, 1  ;;  %v421_v4 = vrot.slane %v3601_v62, 1  ;;  %v3339_v7 = vld [vmem:[%s4692_s1 + $0x108] sm:$0xff]   ;;  %v481_v14 = vrot.slane %v3616_v6, 1  ;;  %v3335_v24 = vld [vmem:[%s4692_s1 + $0x90] sm:$0xff]   ;;  %v3336_v27 = vld [vmem:[%s4692_s1 + $0xd8] sm:$0xff]  }
  0x1d   : > { %2759 = vmatprep.subr.bf16.mxu0 %v3320_v8  ;;  %3275 = vmatprep.subr.bf16.mxu1 %v3320_v8  ;;  %v423_v8 = vrot.slane %v3608_v2, 1  ;;  %v617_v18 = vsel %vm554_vm1, %v615_v63, %v616_v0  ;;  %v619_v21 = vsel %vm554_vm1, %v616_v0, %v618_v1  ;;  %v3644_v23 = vpack.c.bf16 %v3557_v42, %v3554_v41  ;;  %v3658_v29 = vld [vmem:[%s3484_s14 + $0x48] sm:$0xff]  ;;  %v3338_v39 = vld [vmem:[%s4692_s1 + $0x98] sm:$0xff]   ;;  %v3678_v45 = vld [vmem:[%s3484_s14 + $0x170] sm:$0xff] }
  0x1e   : > { %1683 = vmatprep.mubr.bf16.mxu1 %v3526_v30  ;;  %v422_v16 = vsel %vm409_vm0, %v420_v3, %v421_v4  ;;  %v3670_v38 = vld [vmem:[%s3484_s14 + $0x168] sm:$0xff]  ;;  %v486_v48 = vrot.slane %v3678_v45, 1  ;;  %v3707_v63 = vpack.c.bf16 %v3616_v6, %v3613_v5  ;;  %v3347_v0 = vld [vmem:[%s4692_s1 + $0x110] sm:$0xff]   ;;  %v621_v1 = vrot.slane %v3557_v42, 2 }
  0x1f   : > { %v424_v19 = vsel %vm409_vm0, %v421_v4, %v423_v8  ;;  %v485_v47 = vrot.slane %v3670_v38, 1  ;;  %v3342_v8 = vld [vmem:[%s4692_s1 + $0xe8] sm:$0xff]  }
  0x20   : > { %2760 = vmatpush3.bf16.msra.mxu0 %v3321_v9  ;;  %3283 = vmatpush3.bf16.msra.mxu1 %v3321_v9  ;;  %v3623_v9 = vld [vmem:[%s3484_s14 + $0x160] sm:$0x3]  ;;  %v3655_v28 = vpack.c.bf16 %v424_v19, %v422_v16  ;;  %v3728_v42 = vld [vmem:[%s3484_s14 + $0x68] sm:$0xff]  ;;  %v626_v16 = vrot.slane %v3616_v6, 2 }
  0x21   : > { %2761 = vmatprep.subr.bf16.mxu0 %v3322_v10  ;;  %3276 = vmatprep.subr.bf16.mxu1 %v3322_v10  ;;  %v480_v10 = vrot.slane %v3613_v5, 1  ;;  %v483_v17 = vrot.slane %v3623_v9, 1  ;;  %v487_v54 = vsel %vm409_vm0, %v485_v47, %v486_v48  ;;  %v431_v19 = vrot.slane %v3728_v42, 1  ;;  %v3766_v47 = vld [vmem:[%s3484_s14 + $0x78] sm:$0xff] }
  0x23   : > { %v482_v20 = vsel %vm409_vm0, %v480_v10, %v481_v14  ;;  %v484_v25 = vsel %vm409_vm0, %v481_v14, %v483_v17  ;;  %v3725_v10 = vld [vmem:[%s3484_s14 + $0x60] sm:$0xff]  ;;  %v628_v17 = vrot.slane %v3623_v9, 2 }
  0x24   : > { %2762 = vmatpush3.bf16.msra.mxu0 %v3323_v22  ;;  %3284 = vmatpush3.bf16.msra.mxu1 %v3323_v22  ;;  %v3640_v22 = vpack.c.bf16 %v3542_v35, %v3539_v34 }
  0x25   : > { %2763 = vmatprep.subr.bf16.mxu0 %v3324_v26  ;;  %3277 = vmatprep.subr.bf16.mxu1 %v3324_v26  ;;  %v3650_v26 = vpack.c.bf16 %v619_v21, %v617_v18  ;;  %v3735_v18 = vld [vmem:[%s3484_s14 + $0x70] sm:$0x3] }
  0x26   : > { %v433_v6 = vrot.slane %v3735_v18, 1 }
  0x28   : > { %2764 = vmatpush3.bf16.msra.mxu0 %v3325_v31  ;;  %3285 = vmatpush3.bf16.msra.mxu1 %v3325_v31  ;;  %v3660_v31 = vpack.c.bf16 %v484_v25, %v482_v20  ;;  %v3344_v25 = vld [vmem:[%s4692_s1 + $0xf0] sm:$0xff]  }
  0x29   : > { %2765 = vmatprep.subr.bf16.mxu0 %v3326_v32  ;;  %3278 = vmatprep.subr.bf16.mxu1 %v3326_v32  ;;  %v3663_v32 = vld [vmem:[%s3484_s14 + $0x50] sm:$0xff] }
  0x2a   : > { %v426_v40 = vrot.slane %v3663_v32, 1 }
  0x2c   : > { %2766 = vmatpush3.bf16.msra.mxu0 %v3327_v33  ;;  %3286 = vmatpush3.bf16.msra.mxu1 %v3327_v33  ;;  %v3666_v33 = vld [vmem:[%s3484_s14 + $0x58] sm:$0x3] }
  0x2d   : > { %2863 = vmatprep.subr.bf16.mxu1 %v3328_v37  ;;  %2975 = vmatprep.subr.bf16.mxu0 %v3329_v46  ;;  %v425_v37 = vrot.slane %v3658_v29, 1  ;;  %v428_v44 = vrot.slane %v3666_v33, 1  ;;  %v3681_v46 = vld [vmem:[%s3484_s14 + $0x178] sm:$0x3] }
  0x2e   : > { %v488_v49 = vrot.slane %v3681_v46, 1 }
  0x2f   : > { %1588 = vmatmul.mubr.bf16.vlgmr.msra.gmra.mrb[0].mxu0 %v329_v50  ;;  %1684 = vmatmul.mubr.bf16.vlgmr.msra.gmra.mrb[0].mxu1 %v3574_v51  ;;  %v3340_v50 = vld [vmem:[%s4692_s1 + $0xe0] sm:$0xff]   ;;  %v429_v53 = vsel %vm409_vm0, %v426_v40, %v428_v44  ;;  %v3353_v44 = vld [vmem:[%s4692_s1 + $0x118] sm:$0xff]  }
  0x30   : > { %2864 = vmatpush3.bf16.msra.mxu1 %v3330_v52  ;;  %2976 = vmatpush3.bf16.msra.mxu0 %v3331_v55  ;;  %v427_v52 = vsel %vm409_vm0, %v425_v37, %v426_v40  ;;  %v489_v55 = vsel %vm409_vm0, %v486_v48, %v488_v49  ;;  %v3352_v40 = vld [vmem:[%s4692_s1 + $0x158] sm:$0xff]   ;;  %v555_v48 = vrot.slane %v3493_v11, 2  ;;  %v3771_v49 = vpack.c.bf16 %v3663_v32, %v3658_v29  ;;  %v3346_v11 = vld [vmem:[%s4692_s1 + $0xb0] sm:$0xff]  }
  0x31   : > { %2865 = vmatprep.subr.bf16.mxu1 %v3332_v56  ;;  %1595 = vmatprep.mubr.bf16.mxu0 %v3587_v57  ;;  %v3345_v56 = vld [vmem:[%s4692_s1 + $0x150] sm:$0xff]   ;;  %v3716_v3 = vpack.c.bf16 %v429_v53, %v427_v52  ;;  %v3718_v4 = vpack.c.bf16 %v489_v55, %v487_v54  ;;  %v3778_v52 = vld [vmem:[%s3484_s14 + $0x80] sm:$0xff]  ;;  %v3781_v53 = vld [vmem:[%s3484_s14 + $0x88] sm:$0x3]  ;;  %v556_v54 = vrot.slane %v3496_v12, 2  ;;  %v558_v55 = vrot.slane %v3499_v13, 2 }
  0x32   : > { %1691 = vmatprep.mubr.bf16.mxu1 %v3592_v59  ;;  %2977 = vmatprep.subr.bf16.mxu0 %v3337_v60  ;;  %v3703_v60 = vpack.c.bf16 %v3601_v62, %v3598_v61  ;;  %v438_v12 = vrot.slane %v3781_v53, 1  ;;  %v3354_v13 = vld [vmem:[%s4692_s1 + $0x160] sm:$0xff]  }
  0x33   : > { %4700 = vst [vmem:[#allocation3_spill] sm:$0xff] %v3718_v4 }
  0x34   : > { %2866 = vmatpush3.bf16.msra.mxu1 %v3333_v58  ;;  %2978 = vmatpush3.bf16.msra.mxu0 %v3339_v7  ;;  %v620_v58 = vrot.slane %v3554_v41, 2  ;;  %v3341_v41 = vld [vmem:[%s4692_s1 + $0xa0] sm:$0xff]   ;;  %v623_v7 = vrot.slane %v3560_v43, 2  ;;  %v430_v43 = vrot.slane %v3725_v10, 1 }
  0x35   : > { %2867 = vmatprep.subr.bf16.mxu1 %v3334_v15  ;;  %2979 = vmatprep.subr.bf16.mxu0 %v3345_v56  ;;  %v625_v15 = vrot.slane %v3613_v5, 2  ;;  %v3343_v5 = vld [vmem:[%s4692_s1 + $0xa8] sm:$0xff]   ;;  %v3348_v56 = vld [vmem:[%s4692_s1 + $0xf8] sm:$0xff]  }
  0x36   : > { %v622_v14 = vsel %vm554_vm1, %v620_v58, %v621_v1  ;;  %v624_v20 = vsel %vm554_vm1, %v621_v1, %v623_v7  ;;  %v432_v37 = vsel %vm409_vm0, %v430_v43, %v431_v19  ;;  %v436_v1 = vrot.slane %v3778_v52, 1 }
  0x37   : > { %1596 = vmatmul.mubr.bf16.gmra.mrb[4].mxu0 %v3640_v22  ;;  %1692 = vmatmul.mubr.bf16.gmra.mrb[4].mxu1 %v3644_v23  ;;  %v3746_v9 = vpack.c.bf16 %v624_v20, %v622_v14  ;;  %v627_v21 = vsel %vm554_vm1, %v625_v15, %v626_v16  ;;  %v630_v7 = vrot.slane %v3670_v38, 2  ;;  %v557_v14 = vsel %vm554_vm1, %v555_v48, %v556_v54  ;;  %v3356_v15 = vld [vmem:[%s4692_s1 + $0x120] sm:$0xff]   ;;  %v3355_v48 = vld [vmem:[%s4692_s1 + $0x1c8] sm:$0xff]  }
  0x38   : > { %2868 = vmatpush3.bf16.msra.mxu1 %v3335_v24  ;;  %1603 = vmatprep.mubr.bf16.mxu0 %v3655_v28  ;;  %v629_v24 = vsel %vm554_vm1, %v626_v16, %v628_v17  ;;  %v3350_v16 = vld [vmem:[%s4692_s1 + $0x1c0] sm:$0xff]   ;;  %v439_v17 = vsel %vm409_vm0, %v436_v1, %v438_v12  ;;  %v560_v43 = vrot.slane %v3539_v34, 2  ;;  %v631_v20 = vrot.slane %v3678_v45, 2  ;;  %v3358_v34 = vld [vmem:[%s4692_s1 + $0x168] sm:$0xff]   ;;  %v3870_v12 = vld [vmem:[%s3484_s14 + $0xb8] sm:$0x3] }
  0x39   : > { %2869 = vmatprep.subr.bf16.mxu1 %v3336_v27  ;;  %1699 = vmatprep.mubr.bf16.mxu1 %v3660_v31  ;;  %v3754_v27 = vpack.c.bf16 %v629_v24, %v627_v21  ;;  %v3827_v21 = vld [vmem:[%s3484_s14 + $0xa0] sm:$0x3] }
  0x3a   : > { %2980 = vmatpush3.bf16.msra.mxu0 %v3347_v0  ;;  %v435_v0 = vrot.slane %v3766_v47, 1 }
  0x3b   : > { %2981 = vmatprep.subr.bf16.mxu0 %v3352_v40 }
  0x3c   : > { %2870 = vmatpush3.bf16.msra.mxu1 %v3338_v39  ;;  %v434_v39 = vsel %vm409_vm0, %v431_v19, %v433_v6  ;;  %v3819_v19 = vld [vmem:[%s3484_s14 + $0x90] sm:$0xff]  ;;  %v3824_v6 = vld [vmem:[%s3484_s14 + $0x98] sm:$0xff] }
  0x3d   : > { %2871 = vmatprep.subr.bf16.mxu1 %v3340_v50  ;;  %v3775_v50 = vpack.c.bf16 %v3678_v45, %v3670_v38  ;;  %v3791_v58 = vpack.c.bf16 %v434_v39, %v432_v37  ;;  %v437_v38 = vsel %vm409_vm0, %v435_v0, %v436_v1  ;;  %v3351_v37 = vld [vmem:[%s4692_s1 + $0x180] sm:$0xff]   ;;  %v441_v40 = vrot.slane %v3824_v6, 1  ;;  %v3863_v0 = vld [vmem:[%s3484_s14 + $0xa8] sm:$0xff]  ;;  %v3867_v1 = vld [vmem:[%s3484_s14 + $0xb0] sm:$0xff] }
  0x3e   : > { %2982 = vmatpush3.bf16.msra.mxu0 %v3353_v44  ;;  %v3845_v39 = vpack.c.bf16 %v439_v17, %v437_v38  ;;  %v443_v44 = vrot.slane %v3827_v21, 1  ;;  %v3889_v38 = vpack.c.bf16 %v3778_v52, %v3766_v47  ;;  %v566_v17 = vrot.slane %v3601_v62, 2  ;;  %v3364_v62 = vld [vmem:[%s4692_s1 + $0x1d8] sm:$0xff]  }
  0x3f   : > { %1604 = vmatmul.mubr.bf16.gmra.mrb[8].mxu0 %v3703_v60  ;;  %1700 = vmatmul.mubr.bf16.gmra.mrb[8].mxu1 %v3707_v63 }
  0x40   : > { %2872 = vmatpush3.bf16.msra.mxu1 %v3341_v41  ;;  %1611 = vmatprep.mubr.bf16.mxu0 %v3716_v3  ;;  %v3349_v41 = vld [vmem:[%s4692_s1 + $0xb8] sm:$0xff]  }
  0x41   : > { %2873 = vmatprep.subr.bf16.mxu1 %v3342_v8  ;;  %1707 = vmatprep.mubr.bf16.mxu1 %v3718_v4  ;;  %v559_v8 = vsel %vm554_vm1, %v556_v54, %v558_v55  ;;  %v3357_v54 = vld [vmem:[%s4692_s1 + $0x188] sm:$0xff]   ;;  %v590_v4 = vrot.slane %v3863_v0, 2 }
  0x42   : > { %2983 = vmatprep.subr.bf16.mxu0 %v3354_v13  ;;  %v667_v24 = vpack.c.bf16 %v559_v8, %v557_v14  ;;  %v3359_v55 = vld [vmem:[%s4692_s1 + $0x128] sm:$0xff]   ;;  %v3362_v8 = vld [vmem:[%s4692_s1 + $0x170] sm:$0xff]  }
  0x43   : > { %2984 = vmatpush3.bf16.msra.mxu0 %v3356_v15  ;;  %v565_v15 = vrot.slane %v3598_v61, 2  ;;  %v446_v61 = vrot.slane %v3867_v1, 1 }
  0x44   : > { %2874 = vmatpush3.bf16.msra.mxu1 %v3343_v5  ;;  %v561_v5 = vrot.slane %v3542_v35, 2  ;;  %v3840_v35 = vsel %vm554_vm1, %v630_v7, %v631_v20  ;;  %2985 = vmatprep.subr.bf16.mxu0 %v3358_v34  ;;  %v3360_v7 = vld [vmem:[%s4692_s1 + $0x1d0] sm:$0xff]  }
  0x45   : > { %2875 = vmatprep.subr.bf16.mxu1 %v3344_v25  ;;  %v563_v25 = vrot.slane %v3545_v36, 2  ;;  %v440_v36 = vrot.slane %v3819_v19, 1  ;;  %v3361_v34 = vld [vmem:[%s4692_s1 + $0x190] sm:$0xff]  }
  0x47   : > { %1612 = vmatmul.mubr.bf16.gmra.mrb[12].mxu0 %v3771_v49  ;;  %1708 = vmatmul.mubr.bf16.gmra.mrb[12].mxu1 %v3775_v50  ;;  %v442_v13 = vsel %vm409_vm0, %v440_v36, %v441_v40  ;;  %v3913_v36 = vld [vmem:[%s3484_s14 + $0xc8] sm:$0xff] }
  0x48   : > { %2876 = vmatpush3.bf16.msra.mxu1 %v3346_v11  ;;  %1619 = vmatprep.mubr.bf16.mxu0 %v3791_v58  ;;  %v562_v11 = vsel %vm554_vm1, %v560_v43, %v561_v5  ;;  %v568_v43 = vrot.slane %v3608_v2, 2  ;;  %v3366_v2 = vld [vmem:[%s4692_s1 + $0x178] sm:$0xff]  }
  0x49   : > { %2877 = vmatprep.subr.bf16.mxu1 %v3348_v56  ;;  %1748 = vmatprep.mubr.bf16.mxu1 %v3640_v22  ;;  %v3831_v22 = vpack.c.bf16 %v3728_v42, %v3725_v10  ;;  %v564_v56 = vsel %vm554_vm1, %v561_v5, %v563_v25  ;;  %v445_v5 = vrot.slane %v3863_v0, 1  ;;  %v448_v25 = vrot.slane %v3870_v12, 1 }
  0x4a   : > { %v3881_v14 = vpack.c.bf16 %v564_v56, %v562_v11  ;;  %2986 = vmatpush3.bf16.msra.mxu0 %v3359_v55  ;;  %v3365_v55 = vld [vmem:[%s4692_s1 + $0x198] sm:$0xff]  }
  0x4b   : > { %2987 = vmatprep.subr.bf16.mxu0 %v3362_v8  ;;  %v447_v11 = vsel %vm409_vm0, %v445_v5, %v446_v61  ;;  %v449_v56 = vsel %vm409_vm0, %v446_v61, %v448_v25  ;;  %v3941_v8 = vpack.c.bf16 %v3824_v6, %v3819_v19  ;;  %v451_v5 = vrot.slane %v3913_v36, 1  ;;  %v3370_v25 = vld [vmem:[%s4692_s1 + $0x1a0] sm:$0xff]  }
  0x4c   : > { %2878 = vmatpush3.bf16.msra.mxu1 %v3349_v41  ;;  %v444_v41 = vsel %vm409_vm0, %v441_v40, %v443_v44  ;;  %v3367_v40 = vld [vmem:[%s4692_s1 + $0x138] sm:$0xff]   ;;  %v567_v44 = vsel %vm554_vm1, %v565_v15, %v566_v17 }
  0x4d   : > { %3087 = vmatprep.subr.bf16.mxu1 %v3350_v16  ;;  %v3363_v16 = vld [vmem:[%s4692_s1 + $0x130] sm:$0xff]  }
  0x4e   : > { %2988 = vmatpush3.bf16.msra.mxu0 %v3363_v16  ;;  %v573_v16 = vrot.slane %v3666_v33, 2 }
  0x4f   : > { %1620 = vmatmul.mubr.bf16.gmra.mrb[16].mxu0 %v3831_v22  ;;  %1749 = vmatmul.mubr.bf16.vlgmr.msra.gmra.mrb[16].mxu1 %v667_v24  ;;  %v3894_v24 = vpack.c.bf16 %v444_v41, %v442_v13  ;;  %v570_v13 = vrot.slane %v3658_v29, 2  ;;  %v3368_v41 = vld [vmem:[%s4692_s1 + $0x1e0] sm:$0xff]   ;;  %v571_v29 = vrot.slane %v3663_v32, 2  ;;  %v3371_v32 = vld [vmem:[%s4692_s1 + $0x1e8] sm:$0xff]  }
  0x50   : > { %3088 = vmatpush3.bf16.msra.mxu1 %v3351_v37  ;;  %1627 = vmatprep.mubr.bf16.mxu0 %v3845_v39  ;;  %v3910_v37 = vld [vmem:[%s3484_s14 + $0xc0] sm:$0xff] }
  0x51   : > { %1756 = vmatprep.mubr.bf16.mxu1 %v3703_v60  ;;  %3089 = vmatprep.subr.bf16.mxu1 %v3355_v48  ;;  %v569_v48 = vsel %vm554_vm1, %v566_v17, %v568_v43  ;;  %v3948_v17 = vpack.c.bf16 %v449_v56, %v447_v11  ;;  %v450_v43 = vrot.slane %v3910_v37, 1  ;;  %v572_v33 = vsel %vm554_vm1, %v570_v13, %v571_v29  ;;  %v3373_v11 = vld [vmem:[%s4692_s1 + $0x1a8] sm:$0xff]   ;;  %v3374_v56 = vld [vmem:[%s4692_s1 + $0x1f0] sm:$0xff]  }
  0x52   : > { %2989 = vmatprep.subr.bf16.mxu0 %v3366_v2  ;;  %v3943_v15 = vpack.c.bf16 %v569_v48, %v567_v44  ;;  %v3969_v2 = vld [vmem:[%s3484_s14 + $0xe0] sm:$0xff]  ;;  %v633_v44 = vrot.slane %v3681_v46, 2  ;;  %v3988_v46 = vpack.c.bf16 %v3867_v1, %v3863_v0 }
  0x53   : > { %2990 = vmatpush3.bf16.msra.mxu0 %v3367_v40  ;;  %v3972_v40 = vld [vmem:[%s3484_s14 + $0xe8] sm:$0x3]  ;;  %v452_v48 = vsel %vm409_vm0, %v450_v43, %v451_v5 }
  0x54   : > { %3090 = vmatpush3.bf16.msra.mxu1 %v3357_v54  ;;  %v3923_v54 = vld [vmem:[%s3484_s14 + $0xd0] sm:$0x3]  ;;  %v634_v13 = vsel %vm554_vm1, %v631_v20, %v633_v44  ;;  %4701 = vst [vmem:[#allocation4_spill] sm:$0xff] %v3988_v46  ;;  %v456_v20 = vrot.slane %v3969_v2, 1 }
  0x55   : > { %3091 = vmatprep.subr.bf16.mxu1 %v3360_v7  ;;  %v3937_v7 = vld [vmem:[%s4692_s1 + $0x200] sm:$0xff]   ;;  %v453_v61 = vrot.slane %v3923_v54, 1  ;;  %v4021_v44 = vld [vmem:[%s3484_s14 + $0xf0] sm:$0xff] }
  0x56   : > { %3223 = vmatprep.subr.bf16.mxu0 %v3937_v7 }
  0x57   : > { %1628 = vmatmul.mubr.bf16.gmra.mrb[20].mxu0 %v3889_v38  ;;  %1757 = vmatmul.mubr.bf16.gmra.mrb[20].mxu1 %v3881_v14 }
  0x58   : > { %1635 = vmatprep.mubr.bf16.mxu0 %v3894_v24  ;;  %1764 = vmatprep.mubr.bf16.mxu1 %v3771_v49 }
  0x59   : > { %3092 = vmatpush3.bf16.msra.mxu1 %v3361_v34  ;;  %v574_v34 = vsel %vm554_vm1, %v571_v29, %v573_v16  ;;  %v575_v29 = vrot.slane %v3725_v10, 2  ;;  %v3994_v16 = vpack.c.bf16 %v634_v13, %v3840_v35  ;;  %v3376_v10 = vld [vmem:[%s4692_s1 + $0x1b0] sm:$0xff]  }
  0x5a   : > { %3093 = vmatprep.subr.bf16.mxu1 %v3364_v62  ;;  %v3966_v62 = vld [vmem:[%s3484_s14 + $0xd8] sm:$0xff] }
  0x5b   : > { %v455_v45 = vrot.slane %v3966_v62, 1 }
  0x5d   : > { %3094 = vmatpush3.bf16.msra.mxu1 %v3365_v55  ;;  %v454_v55 = vsel %vm409_vm0, %v451_v5, %v453_v61  ;;  %v576_v5 = vrot.slane %v3728_v42, 2  ;;  %v578_v61 = vrot.slane %v3735_v18, 2  ;;  %v3377_v42 = vld [vmem:[%s4692_s1 + $0x1f8] sm:$0xff]  }
  0x5e   : > { %3095 = vmatprep.subr.bf16.mxu1 %v3368_v41  ;;  %v3990_v41 = vpack.c.bf16 %v574_v34, %v572_v33  ;;  %v3996_v43 = vpack.c.bf16 %v454_v55, %v452_v48  ;;  %v3379_v34 = vld [vmem:[%s4692_s1 + $0x1b8] sm:$0xff]   ;;  %v4027_v55 = vld [vmem:[%s3484_s14 + $0x100] sm:$0x3] }
  0x5f   : > { %1636 = vmatmul.mubr.bf16.gmra.mrb[24].mxu0 %v3941_v8  ;;  %1765 = vmatmul.mubr.bf16.gmra.mrb[24].mxu1 %v3943_v15  ;;  %v577_v18 = vsel %vm554_vm1, %v575_v29, %v576_v5  ;;  %v579_v35 = vsel %vm554_vm1, %v576_v5, %v578_v61  ;;  %v4024_v48 = vld [vmem:[%s3484_s14 + $0xf8] sm:$0xff]  ;;  %v580_v29 = vrot.slane %v3766_v47, 2  ;;  %v581_v5 = vrot.slane %v3778_v52, 2 }
  0x60   : > { %1643 = vmatprep.mubr.bf16.mxu0 %v3948_v17  ;;  %1772 = vmatprep.mubr.bf16.mxu1 %v3831_v22  ;;  %v583_v61 = vrot.slane %v3781_v53, 2 }
  0x61   : > { %3096 = vmatpush3.bf16.msra.mxu1 %v3370_v25  ;;  %v458_v25 = vrot.slane %v3972_v40, 1  ;;  %v582_v47 = vsel %vm554_vm1, %v580_v29, %v581_v5  ;;  %v585_v29 = vrot.slane %v3819_v19, 2 }
  0x62   : > { %3097 = vmatprep.subr.bf16.mxu1 %v3371_v32  ;;  %v457_v32 = vsel %vm409_vm0, %v455_v45, %v456_v20  ;;  %v460_v45 = vrot.slane %v4021_v44, 1  ;;  %v584_v52 = vsel %vm554_vm1, %v581_v5, %v583_v61  ;;  %v586_v5 = vrot.slane %v3824_v6, 2 }
  0x63   : > { %v459_v33 = vsel %vm409_vm0, %v456_v20, %v458_v25  ;;  %v461_v20 = vrot.slane %v4024_v48, 1  ;;  %v463_v25 = vrot.slane %v4027_v55, 1  ;;  %v588_v61 = vrot.slane %v3827_v21, 2 }
  0x64   : > { %v4035_v13 = vpack.c.bf16 %v459_v33, %v457_v32  ;;  %v4062_v32 = vpack.c.bf16 %v3969_v2, %v3966_v62  ;;  %v4064_v33 = vpack.c.bf16 %v584_v52, %v582_v47  ;;  %v587_v19 = vsel %vm554_vm1, %v585_v29, %v586_v5 }
  0x65   : > { %3098 = vmatpush3.bf16.msra.mxu1 %v3373_v11  ;;  %v4031_v11 = vpack.c.bf16 %v3913_v36, %v3910_v37  ;;  %v462_v53 = vsel %vm409_vm0, %v460_v45, %v461_v20  ;;  %v589_v6 = vsel %vm554_vm1, %v586_v5, %v588_v61  ;;  %v4084_v52 = vpack.c.bf16 %v4024_v48, %v4021_v44  ;;  %v4096_v5 = vld [vmem:[%s3484_s14 + $0x180] sm:$0xff]  ;;  %v4099_v61 = vld [vmem:[%s3484_s14 + $0x188] sm:$0xff] }
  0x66   : > { %3099 = vmatprep.subr.bf16.mxu1 %v3374_v56  ;;  %v4033_v56 = vpack.c.bf16 %v579_v35, %v577_v18  ;;  %v4055_v18 = vld [vmem:[%s3484_s14 + $0x110] sm:$0xff]  ;;  %v4058_v35 = vld [vmem:[%s3484_s14 + $0x118] sm:$0x3]  ;;  %v593_v29 = vrot.slane %v3870_v12, 2  ;;  %v720_v12 = vrot.slane %v4099_v61, 1 }
  0x67   : > { %1644 = vmatmul.mubr.bf16.gmra.mrb[28].mxu0 %v3988_v46  ;;  %1773 = vmatmul.mubr.bf16.gmra.mrb[28].mxu1 %v3990_v41  ;;  %4702 = vst [vmem:[#allocation5_spill] sm:$0xff] %v4031_v11 }
  0x68   : > { %1651 = vmatprep.mubr.bf16.mxu0 %v3996_v43  ;;  %1780 = vmatprep.mubr.bf16.mxu1 %v3889_v38 }
  0x69   : > { %3100 = vmatpush3.bf16.msra.mxu1 %v3376_v10  ;;  %v464_v10 = vsel %vm409_vm0, %v461_v20, %v463_v25  ;;  %v466_v20 = vrot.slane %v4055_v18, 1  ;;  %v468_v25 = vrot.slane %v4058_v35, 1 }
  0x6a   : > { %3101 = vmatprep.subr.bf16.mxu1 %v3377_v42  ;;  %v4052_v42 = vld [vmem:[%s3484_s14 + $0x108] sm:$0xff] }
  0x6b   : > { %v465_v45 = vrot.slane %v4052_v42, 1  ;;  %v469_v47 = vsel %vm409_vm0, %v466_v20, %v468_v25 }
  0x6d   : > { %3102 = vmatpush3.bf16.msra.mxu1 %v3379_v34  ;;  %v4066_v34 = vpack.c.bf16 %v464_v10, %v462_v53  ;;  %v467_v21 = vsel %vm409_vm0, %v465_v45, %v466_v20  ;;  %v4086_v53 = vpack.c.bf16 %v589_v6, %v587_v19  ;;  %v4108_v20 = vld [vmem:[%s3484_s14 + $0x190] sm:$0x3]  ;;  %v4113_v19 = vpack.c.bf16 %v4055_v18, %v4052_v42 }
  0x6e   : > { %v4088_v10 = vpack.c.bf16 %v469_v47, %v467_v21  ;;  %v722_v25 = vrot.slane %v4108_v20, 1  ;;  %v595_v21 = vrot.slane %v3910_v37, 2 }
  0x6f   : > { %1652 = vmatmul.mubr.bf16.gmra.mrb[32].mxu0 %v4031_v11  ;;  %1781 = vmatmul.mubr.bf16.gmra.mrb[32].mxu1 %v4033_v56 }
  0x70   : > { %1659 = vmatprep.mubr.bf16.mxu0 %v4035_v13  ;;  %1788 = vmatprep.mubr.bf16.mxu1 %v3941_v8 }
  0x77   : > { %1660 = vmatmul.mubr.bf16.gmra.mrb[36].mxu0 %v4062_v32  ;;  %1789 = vmatmul.mubr.bf16.gmra.mrb[36].mxu1 %v4064_v33 }
  0x78   : > { %1667 = vmatprep.mubr.bf16.mxu0 %v4066_v34  ;;  %1796 = vmatprep.mubr.bf16.mxu1 %v3988_v46  ;;  %v591_v46 = vrot.slane %v3867_v1, 2  ;;  %v719_v1 = vrot.slane %v4096_v5, 1 }
  0x7a   : > { %v592_v45 = vsel %vm554_vm1, %v590_v4, %v591_v46  ;;  %v594_v0 = vsel %vm554_vm1, %v591_v46, %v593_v29  ;;  %v596_v4 = vrot.slane %v3913_v36, 2  ;;  %v598_v46 = vrot.slane %v3923_v54, 2 }
  0x7b   : > { %v4115_v6 = vpack.c.bf16 %v594_v0, %v592_v45  ;;  %v721_v47 = vsel %vm409_vm0, %v719_v1, %v720_v12  ;;  %v723_v29 = vsel %vm409_vm0, %v720_v12, %v722_v25  ;;  %v600_v54 = vrot.slane %v3966_v62, 2  ;;  %v3372_v12 = vld [vmem:[%s4692_s1 + $0x208] sm:$0xff]  }
  0x7c   : > { %v597_v37 = vsel %vm554_vm1, %v595_v21, %v596_v4  ;;  %v599_v36 = vsel %vm554_vm1, %v596_v4, %v598_v46  ;;  %v601_v0 = vrot.slane %v3969_v2, 2  ;;  %v603_v1 = vrot.slane %v3972_v40, 2  ;;  %v3375_v2 = vld [vmem:[%s4692_s1 + $0x210] sm:$0xff]   ;;  %v3378_v21 = vld [vmem:[%s4692_s1 + $0x218] sm:$0xff]  }
  0x7d   : > { %v4130_v45 = vpack.c.bf16 %v599_v36, %v597_v37  ;;  %v605_v25 = vrot.slane %v4021_v44, 2  ;;  %v610_v46 = vrot.slane %v4052_v42, 2  ;;  %v3381_v37 = vld [vmem:[%s4692_s1 + $0x228] sm:$0xff]  }
  0x7e   : > { %v604_v62 = vsel %vm554_vm1, %v601_v0, %v603_v1 }
  0x7f   : > { %1668 = vmatmul.mubr.bf16.gmra.mrb[40].mxu0 %v4084_v52  ;;  %1797 = vmatmul.mubr.bf16.gmra.mrb[40].mxu1 %v4086_v53 }
  0x80   : > { %1675 = vmatprep.mubr.bf16.mxu0 %v4088_v10  ;;  %1804 = vmatprep.mubr.bf16.mxu1 %v4031_v11  ;;  %v4122_v11 = vpack.c.bf16 %v723_v29, %v721_v47  ;;  %v611_v47 = vrot.slane %v4055_v18, 2  ;;  %v613_v29 = vrot.slane %v4058_v35, 2  ;;  %v3382_v35 = vld [vmem:[%s4692_s1 + $0x230] sm:$0xff]  }
  0x82   : > { %v612_v42 = vsel %vm554_vm1, %v610_v46, %v611_v47  ;;  %v614_v18 = vsel %vm554_vm1, %v611_v47, %v613_v29 }
  0x83   : > { %v4182_v36 = vpack.c.bf16 %v614_v18, %v612_v42 }
  0x87   : > { %1676 = vmatmul.mubr.bf16.gmra.mrb[44].mxu0 %v4113_v19  ;;  %1805 = vmatmul.mubr.bf16.gmra.mrb[44].mxu1 %v4115_v6 }
  0x88   : > { %1812 = vmatprep.mubr.bf16.mxu1 %v4062_v32  ;;  %1909 = vmatprep.mubr.bf16.mxu0 %v3881_v14  ;;  %v602_v14 = vsel %vm554_vm1, %v600_v54, %v601_v0  ;;  %v3383_v54 = vld [vmem:[%s4692_s1 + $0x238] sm:$0xff]   ;;  %v4201_v0 = vpack.c.bf16 %v4099_v61, %v4096_v5 }
  0x89   : > { %v4148_v40 = vpack.c.bf16 %v604_v62, %v602_v14 }
  0x8f   : > { %1813 = vmatmul.mubr.bf16.gmra.mrb[48].mxu1 %v4130_v45  ;;  %1910 = vmatmul.mubr.bf16.vlgmr.msra.gmra.mrb[48].mxu0 %v3587_v57  ;;  %v606_v57 = vrot.slane %v4024_v48, 2 }
  0x90   : > { %3224 = vmatpush3.bf16.msra.mxu0 %v3937_v7  ;;  %1820 = vmatprep.mubr.bf16.mxu1 %v4084_v52  ;;  %v608_v7 = vrot.slane %v4027_v55, 2  ;;  %v3380_v55 = vld [vmem:[%s4692_s1 + $0x220] sm:$0xff]  }
  0x91   : > { %1917 = vmatprep.mubr.bf16.mxu0 %v3943_v15  ;;  %3225 = vmatprep.subr.bf16.mxu0 %v3372_v12  ;;  %v607_v44 = vsel %vm554_vm1, %v605_v25, %v606_v57 }
  0x92   : > { %v609_v48 = vsel %vm554_vm1, %v606_v57, %v608_v7 }
  0x93   : > { %v4165_v4 = vpack.c.bf16 %v609_v48, %v607_v44 }
  0x94   : > { %3226 = vmatpush3.bf16.msra.mxu0 %v3372_v12 }
  0x95   : > { %3227 = vmatprep.subr.bf16.mxu0 %v3375_v2 }
  0x97   : > { %1821 = vmatmul.mubr.bf16.gmra.mrb[52].mxu1 %v4148_v40  ;;  %1918 = vmatmul.mubr.bf16.gmra.mrb[52].mxu0 %v3655_v28 }
  0x98   : > { %1828 = vmatprep.mubr.bf16.mxu1 %v4113_v19  ;;  %1925 = vmatprep.mubr.bf16.mxu0 %v3990_v41 }
  0x99   : > { %3228 = vmatpush3.bf16.msra.mxu0 %v3375_v2 }
  0x9a   : > { %3229 = vmatprep.subr.bf16.mxu0 %v3378_v21 }
  0x9d   : > { %3230 = vmatpush3.bf16.msra.mxu0 %v3378_v21 }
  0x9e   : > { %3231 = vmatprep.subr.bf16.mxu0 %v3380_v55 }
  0x9f   : > { %1829 = vmatmul.mubr.bf16.gmra.mrb[56].mxu1 %v4165_v4  ;;  %1926 = vmatmul.mubr.bf16.gmra.mrb[56].mxu0 %v3716_v3 }
  0xa0   : > { %1836 = vmatprep.mubr.bf16.mxu1 %v3574_v51  ;;  %1933 = vmatprep.mubr.bf16.mxu0 %v4033_v56 }
  0xa1   : > { %3232 = vmatpush3.bf16.msra.mxu0 %v3380_v55 }
  0xa2   : > { %3233 = vmatprep.subr.bf16.mxu0 %v3381_v37 }
  0xa5   : > { %3234 = vmatpush3.bf16.msra.mxu0 %v3381_v37 }
  0xa6   : > { %3235 = vmatprep.subr.bf16.mxu0 %v3382_v35 }
  0xa7   : > { %1837 = vmatmul.mubr.bf16.gmra.mrb[60].mxu1 %v4182_v36  ;;  %1934 = vmatmul.mubr.bf16.gmra.mrb[60].mxu0 %v3791_v58 }
  0xa8   : > { %1844 = vmatprep.mubr.bf16.mxu1 %v3644_v23  ;;  %1941 = vmatprep.mubr.bf16.mxu0 %v4064_v33 }
  0xa9   : > { %3236 = vmatpush3.bf16.msra.mxu0 %v3382_v35 }
  0xaa   : > { %3237 = vmatprep.subr.bf16.mxu0 %v3383_v54 }
  0xad   : > { %3238 = vmatpush3.bf16.msra.mxu0 %v3383_v54 }
  0xaf   : > { %1845 = vmatmul.mubr.bf16.gmra.mrb[64].mxu1 %v3650_v26  ;;  %1942 = vmatmul.mubr.bf16.gmra.mrb[64].mxu0 %v3845_v39 }
  0xb0   : > { %1852 = vmatprep.mubr.bf16.mxu1 %v3707_v63  ;;  %1949 = vmatprep.mubr.bf16.mxu0 %v4086_v53 }
  0xb7   : > { %1853 = vmatmul.mubr.bf16.gmra.mrb[68].mxu1 %v3746_v9  ;;  %1950 = vmatmul.mubr.bf16.gmra.mrb[68].mxu0 %v3894_v24 }
  0xb8   : > { %1860 = vmatprep.mubr.bf16.mxu1 %v3775_v50  ;;  %1957 = vmatprep.mubr.bf16.mxu0 %v4115_v6 }
  0xbf   : > { %1861 = vmatmul.mubr.bf16.gmra.mrb[72].mxu1 %v3754_v27  ;;  %1958 = vmatmul.mubr.bf16.gmra.mrb[72].mxu0 %v3948_v17 }
  0xc0   : > { %1868 = vmatprep.mubr.bf16.mxu1 %v4201_v0  ;;  %1965 = vmatprep.mubr.bf16.mxu0 %v4130_v45 }
  0xc7   : > { %1869 = vmatmul.mubr.bf16.gmra.mrb[76].mxu1 %v3994_v16  ;;  %1966 = vmatmul.mubr.bf16.gmra.mrb[76].mxu0 %v3996_v43 }
  0xc8   : > { %1973 = vmatprep.mubr.bf16.mxu0 %v4148_v40  ;;  %2070 = vmatprep.mubr.bf16.mxu1 %v3655_v28  ;;  %v743_v28 = vrot.slane %v4096_v5, 2 }
  0xcf   : > { %1974 = vmatmul.mubr.bf16.gmra.mrb[80].mxu0 %v4035_v13  ;;  %2071 = vmatmul.mubr.bf16.vlgmr.msra.gmra.mrb[80].mxu1 %v3703_v60  ;;  %v744_v60 = vrot.slane %v4099_v61, 2 }
  0xd0   : > { %1981 = vmatprep.mubr.bf16.mxu0 %v4165_v4  ;;  %2078 = vmatprep.mubr.bf16.mxu1 %v3716_v3  ;;  %v746_v3 = vrot.slane %v4108_v20, 2 }
  0xd7   : > { %1982 = vmatmul.mubr.bf16.gmra.mrb[84].mxu0 %v4066_v34  ;;  %2079 = vmatmul.mubr.bf16.gmra.mrb[84].mxu1 %v3771_v49  ;;  %v4703_v49 = vld [vmem:[#allocation4_spill] sm:$0xff] }
  0xd8   : > { %1989 = vmatprep.mubr.bf16.mxu0 %v4182_v36  ;;  %2086 = vmatprep.mubr.bf16.mxu1 %v3791_v58  ;;  %v745_v58 = vsel %vm554_vm1, %v743_v28, %v744_v60 }
  0xdf   : > { %1990 = vmatmul.mubr.bf16.gmra.mrb[88].mxu0 %v4088_v10  ;;  %2087 = vmatmul.mubr.bf16.gmra.mrb[88].mxu1 %v3831_v22  ;;  %v747_v22 = vsel %vm554_vm1, %v744_v60, %v746_v3 }
  0xe0   : > { %1997 = vmatprep.mubr.bf16.mxu0 %v3650_v26  ;;  %2094 = vmatprep.mubr.bf16.mxu1 %v3845_v39  ;;  %v4240_v39 = vpack.c.bf16 %v747_v22, %v745_v58 }
  0xe7   : > { %1998 = vmatmul.mubr.bf16.gmra.mrb[92].mxu0 %v3526_v30  ;;  %2095 = vmatmul.mubr.bf16.gmra.mrb[92].mxu1 %v3889_v38  ;;  %v4704_v38 = vld [vmem:[#allocation3_spill] sm:$0xff] }
  0xe8   : > { %2005 = vmatprep.mubr.bf16.mxu0 %v3746_v9  ;;  %2102 = vmatprep.mubr.bf16.mxu1 %v3894_v24  ;;  %v4705_v24 = vld [vmem:[#allocation5_spill] sm:$0xff] }
  0xef   : > { %2006 = vmatmul.mubr.bf16.gmra.mrb[96].mxu0 %v3592_v59  ;;  %2103 = vmatmul.mubr.bf16.gmra.mrb[96].mxu1 %v3941_v8 }
  0xf0   : > { %2013 = vmatprep.mubr.bf16.mxu0 %v3754_v27  ;;  %2110 = vmatprep.mubr.bf16.mxu1 %v3948_v17 }
  0xf7   : > { %2014 = vmatmul.mubr.bf16.gmra.mrb[100].mxu0 %v3660_v31  ;;  %2111 = vmatmul.mubr.bf16.gmra.mrb[100].mxu1 %v4703_v49 }
  0xf8   : > { %2021 = vmatprep.mubr.bf16.mxu0 %v3994_v16  ;;  %2118 = vmatprep.mubr.bf16.mxu1 %v3996_v43 }
  0xff   : > { %2022 = vmatmul.mubr.bf16.gmra.mrb[104].mxu0 %v4704_v38  ;;  %2119 = vmatmul.mubr.bf16.gmra.mrb[104].mxu1 %v4705_v24 }
 0x100   : > { %2029 = vmatprep.mubr.bf16.mxu0 %v4240_v39  ;;  %2126 = vmatprep.mubr.bf16.mxu1 %v4035_v13 }
 0x102   : > { %v2767_v8 = vpop.f32.mrb[0].mxu0  ;;  %v2839_v17 = vpop.f32.mrb[0].mxu1 }
 0x103   : > { %v2768_v5 = vpop.f32.mrb[1].mxu0  ;;  %v2840_v61 = vpop.f32.mrb[1].mxu1 }
 0x104   : > { %v4246_v20 = vadd.f32 %v2768_v5, %v2767_v8  ;;  %v4248_v43 = vadd.f32 %v2840_v61, %v2839_v17  ;;  %v2770_v1 = vpop.f32.mrb[2].mxu0  ;;  %v2842_v12 = vpop.f32.mrb[2].mxu1 }
 0x105   : > { %v2771_v14 = vpop.f32.mrb[3].mxu0  ;;  %v2843_v62 = vpop.f32.mrb[3].mxu1 }
 0x106   : > { %v4250_v2 = vadd.f32 %v2771_v14, %v2770_v1  ;;  %v4252_v25 = vadd.f32 %v2843_v62, %v2842_v12 }
 0x107   : > { %2030 = vmatmul.mubr.bf16.gmra.mrb[108].mxu0 %v4122_v11  ;;  %2127 = vmatmul.mubr.bf16.gmra.mrb[108].mxu1 %v4062_v32 }
 0x108   : > { %2134 = vmatprep.mubr.bf16.mxu1 %v4066_v34  ;;  %3239 = vmatprep.mubr.bf16.mxu0 %v3943_v15 }
 0x10a   : > { %v2773_v13 = vpop.f32.mrb[4].mxu0  ;;  %v2845_v57 = vpop.f32.mrb[4].mxu1 }
 0x10b   : > { %v2774_v7 = vpop.f32.mrb[5].mxu0  ;;  %v2846_v21 = vpop.f32.mrb[5].mxu1 }
 0x10c   : > { %v4258_v44 = vadd.f32 %v2774_v7, %v2773_v13  ;;  %v4260_v48 = vadd.f32 %v2846_v21, %v2845_v57  ;;  %v2776_v55 = vpop.f32.mrb[6].mxu0  ;;  %v2848_v46 = vpop.f32.mrb[6].mxu1 }
 0x10d   : > { %v2777_v47 = vpop.f32.mrb[7].mxu0  ;;  %v2849_v29 = vpop.f32.mrb[7].mxu1 }
 0x10e   : > { %v4262_v37 = vadd.f32 %v2777_v47, %v2776_v55  ;;  %v4264_v42 = vadd.f32 %v2849_v29, %v2848_v46 }
 0x10f   : > { %2135 = vmatmul.mubr.bf16.gmra.mrb[112].mxu1 %v4084_v52  ;;  %3240 = vmatmul.mubr.bf16.vlgmr.msra.gmra.mrb[112].mxu0 %v3990_v41 }
 0x110   : > { %2142 = vmatprep.mubr.bf16.mxu1 %v4088_v10  ;;  %3243 = vmatprep.mubr.bf16.mxu0 %v4033_v56 }
 0x112   : > { %v2779_v15 = vpop.f32.mrb[8].mxu0  ;;  %v2851_v32 = vpop.f32.mrb[8].mxu1 }
 0x113   : > { %v2780_v34 = vpop.f32.mrb[9].mxu0  ;;  %v2852_v18 = vpop.f32.mrb[9].mxu1 }
 0x114   : > { %v4270_v35 = vadd.f32 %v2780_v34, %v2779_v15  ;;  %v4272_v54 = vadd.f32 %v2852_v18, %v2851_v32  ;;  %v2782_v28 = vpop.f32.mrb[10].mxu0  ;;  %v2854_v60 = vpop.f32.mrb[10].mxu1 }
 0x115   : > { %v2783_v3 = vpop.f32.mrb[11].mxu0  ;;  %v2855_v49 = vpop.f32.mrb[11].mxu1 }
 0x116   : > { %v4274_v58 = vadd.f32 %v2783_v3, %v2782_v28  ;;  %v4276_v52 = vadd.f32 %v2855_v49, %v2854_v60  ;;  %v4323_v49 = vld [vmem:[%s3484_s14 + $0x198] sm:$0xff] }
 0x117   : > { %2143 = vmatmul.mubr.bf16.gmra.mrb[116].mxu1 %v4113_v19  ;;  %3244 = vmatmul.mubr.bf16.gmra.mrb[116].mxu0 %v4064_v33 }
 0x118   : > { %2150 = vmatprep.mubr.bf16.mxu1 %v3526_v30  ;;  %3247 = vmatprep.mubr.bf16.mxu0 %v4086_v53 }
 0x11a   : > { %v2785_v41 = vpop.f32.mrb[12].mxu0  ;;  %v2857_v56 = vpop.f32.mrb[12].mxu1 }
 0x11b   : > { %v2786_v10 = vpop.f32.mrb[13].mxu0  ;;  %v2858_v22 = vpop.f32.mrb[13].mxu1 }
 0x11c   : > { %v4282_v24 = vadd.f32 %v2786_v10, %v2785_v41  ;;  %v4284_v8 = vadd.f32 %v2858_v22, %v2857_v56  ;;  %v2788_v17 = vpop.f32.mrb[14].mxu0  ;;  %v2860_v5 = vpop.f32.mrb[14].mxu1  ;;  %v328_v41 = vld [vmem:[%s3484_s14 + $0x1a8] sm:$0x3] }
 0x11d   : > { %v2789_v61 = vpop.f32.mrb[15].mxu0  ;;  %v2861_v1 = vpop.f32.mrb[15].mxu1 }
 0x11e   : > { %v4286_v12 = vadd.f32 %v2789_v61, %v2788_v17  ;;  %v4288_v19 = vadd.f32 %v2861_v1, %v2860_v5  ;;  %v787_v61 = vrot.slane %v4323_v49, 1  ;;  %v790_v1 = vrot.slane %v328_v41, 1 }
 0x11f   : > { %2151 = vmatmul.mubr.bf16.gmra.mrb[120].mxu1 %v3574_v51  ;;  %3248 = vmatmul.mubr.bf16.gmra.mrb[120].mxu0 %v4115_v6 }
 0x120   : > { %2158 = vmatprep.mubr.bf16.mxu1 %v3592_v59  ;;  %3251 = vmatprep.mubr.bf16.mxu0 %v4130_v45 }
 0x122   : > { %v2791_v30 = vpop.f32.mrb[16].mxu0  ;;  %v2879_v33 = vpop.f32.mrb[16].mxu1 }
 0x123   : > { %v2792_v53 = vpop.f32.mrb[17].mxu0  ;;  %v2880_v14 = vpop.f32.mrb[17].mxu1 }
 0x124   : > { %v4294_v62 = vadd.f32 %v2792_v53, %v2791_v30  ;;  %v2881_v13 = vadd.f32 %v2880_v14, %v2879_v33  ;;  %v2794_v57 = vpop.f32.mrb[18].mxu0  ;;  %v2882_v7 = vpop.f32.mrb[18].mxu1 }
 0x125   : > { %v2795_v21 = vpop.f32.mrb[19].mxu0  ;;  %v2883_v55 = vpop.f32.mrb[19].mxu1 }
 0x126   : > { %v4297_v46 = vadd.f32 %v2881_v13, %v4246_v20  ;;  %v4299_v51 = vadd.f32 %v2795_v21, %v2794_v57  ;;  %v2884_v6 = vadd.f32 %v2883_v55, %v2882_v7  ;;  %v811_v55 = vrot.slane %v4323_v49, 2 }
 0x127   : > { %2159 = vmatmul.mubr.bf16.gmra.mrb[124].mxu1 %v3644_v23  ;;  %3252 = vmatmul.mubr.bf16.gmra.mrb[124].mxu0 %v4148_v40 }
 0x128   : > { %v4304_v59 = vadd.f32 %v2884_v6, %v4250_v2  ;;  %2166 = vmatprep.mubr.bf16.mxu1 %v3660_v31  ;;  %3255 = vmatprep.mubr.bf16.mxu0 %v4165_v4 }
 0x12a   : > { %v2797_v45 = vpop.f32.mrb[20].mxu0  ;;  %v2885_v47 = vpop.f32.mrb[20].mxu1 }
 0x12b   : > { %v2798_v29 = vpop.f32.mrb[21].mxu0  ;;  %v2886_v15 = vpop.f32.mrb[21].mxu1 }
 0x12c   : > { %v4308_v20 = vadd.f32 %v2798_v29, %v2797_v45  ;;  %v2887_v32 = vadd.f32 %v2886_v15, %v2885_v47  ;;  %v2800_v34 = vpop.f32.mrb[22].mxu0  ;;  %v2888_v23 = vpop.f32.mrb[22].mxu1 }
 0x12d   : > { %v2801_v40 = vpop.f32.mrb[23].mxu0  ;;  %v2889_v18 = vpop.f32.mrb[23].mxu1 }
 0x12e   : > { %v4311_v2 = vadd.f32 %v2887_v32, %v4258_v44  ;;  %v4313_v31 = vadd.f32 %v2801_v40, %v2800_v34  ;;  %v2890_v4 = vadd.f32 %v2889_v18, %v2888_v23  ;;  %v327_v44 = vld [vmem:[%s3484_s14 + $0x1a0] sm:$0xff]  ;;  %s2750_s14 = sshll.u32 %s4711_s15, 8 }
 0x12f   : > { %2167 = vmatmul.mubr.bf16.gmra.mrb[128].mxu1 %v3707_v63  ;;  %3256 = vmatmul.mubr.bf16.gmra.mrb[128].mxu0 %v4182_v36  ;;  %s4591_s21 = scalar_lea.vmem %s4693_s2, %s2750_s14 }
 0x130   : > { %v4318_v28 = vadd.f32 %v2890_v4, %v4262_v37  ;;  %2174 = vmatprep.mubr.bf16.mxu1 %v4704_v38  ;;  %3259 = vmatprep.mubr.bf16.mxu0 %v3650_v26  ;;  %v788_v38 = vrot.slane %v327_v44, 1 }
 0x132   : > { %v2803_v60 = vpop.f32.mrb[24].mxu0  ;;  %v2891_v3 = vpop.f32.mrb[24].mxu1  ;;  %v789_v14 = vsel %vm409_vm0, %v787_v61, %v788_v38  ;;  %v791_v13 = vsel %vm409_vm0, %v788_v38, %v790_v1 }
 0x133   : > { %v2804_v56 = vpop.f32.mrb[25].mxu0  ;;  %v2892_v10 = vpop.f32.mrb[25].mxu1  ;;  %v794_v47 = vpack.c.bf16 %v791_v13, %v789_v14 }
 0x134   : > { %v4327_v22 = vadd.f32 %v2804_v56, %v2803_v60  ;;  %v2893_v63 = vadd.f32 %v2892_v10, %v2891_v3  ;;  %v2806_v17 = vpop.f32.mrb[26].mxu0  ;;  %v2894_v36 = vpop.f32.mrb[26].mxu1 }
 0x135   : > { %v2807_v5 = vpop.f32.mrb[27].mxu0  ;;  %v2895_v37 = vpop.f32.mrb[27].mxu1 }
 0x136   : > { %v4331_v26 = vadd.f32 %v2893_v63, %v4270_v35  ;;  %v4333_v30 = vadd.f32 %v2807_v5, %v2806_v17  ;;  %v2896_v33 = vadd.f32 %v2895_v37, %v2894_v36 }
 0x137   : > { %2175 = vmatmul.mubr.bf16.gmra.mrb[132].mxu1 %v3775_v50  ;;  %3260 = vmatmul.mubr.bf16.gmra.mrb[132].mxu0 %v3746_v9  ;;  %v812_v50 = vrot.slane %v327_v44, 2 }
 0x138   : > { %v4338_v53 = vadd.f32 %v2896_v33, %v4274_v58  ;;  %2182 = vmatprep.mubr.bf16.mxu1 %v4122_v11  ;;  %3263 = vmatprep.mubr.bf16.mxu0 %v3754_v27  ;;  %v814_v11 = vrot.slane %v328_v41, 2  ;;  %v767_v41 = vpack.c.bf16 %v327_v44, %v4323_v49 }
 0x139   : > { %v813_v40 = vsel %vm554_vm1, %v811_v55, %v812_v50 }
 0x13a   : > { %v2809_v35 = vpop.f32.mrb[28].mxu0  ;;  %v2897_v57 = vpop.f32.mrb[28].mxu1  ;;  %v815_v18 = vsel %vm554_vm1, %v812_v50, %v814_v11 }
 0x13b   : > { %v2810_v7 = vpop.f32.mrb[29].mxu0  ;;  %v2898_v21 = vpop.f32.mrb[29].mxu1  ;;  %v818_v56 = vpack.c.bf16 %v815_v18, %v813_v40 }
 0x13c   : > { %v4345_v6 = vadd.f32 %v2810_v7, %v2809_v35  ;;  %v2899_v9 = vadd.f32 %v2898_v21, %v2897_v57  ;;  %v2812_v58 = vpop.f32.mrb[30].mxu0  ;;  %v2900_v45 = vpop.f32.mrb[30].mxu1 }
 0x13d   : > { %v2813_v29 = vpop.f32.mrb[31].mxu0  ;;  %v2901_v27 = vpop.f32.mrb[31].mxu1 }
 0x13e   : > { %v4348_v15 = vadd.f32 %v2899_v9, %v4282_v24  ;;  %v4350_v32 = vadd.f32 %v2813_v29, %v2812_v58  ;;  %v2902_v34 = vadd.f32 %v2901_v27, %v2900_v45 }
 0x13f   : > { %2183 = vmatmul.mubr.bf16.gmra.mrb[136].mxu1 %v4201_v0  ;;  %3264 = vmatmul.mubr.bf16.gmra.mrb[136].mxu0 %v3994_v16 }
 0x140   : > { %v4355_v23 = vadd.f32 %v2902_v34, %v4286_v12  ;;  %2190 = vmatprep.mubr.bf16.mxu1 %v794_v47  ;;  %3267 = vmatprep.mubr.bf16.mxu0 %v4240_v39 }
 0x142   : > { %v2815_v4 = vpop.f32.mrb[32].mxu0  ;;  %v2903_v24 = vpop.f32.mrb[32].mxu1 }
 0x143   : > { %v2816_v60 = vpop.f32.mrb[33].mxu0  ;;  %v2904_v3 = vpop.f32.mrb[33].mxu1 }
 0x144   : > { %v4361_v0 = vadd.f32 %v2816_v60, %v2815_v4  ;;  %v2905_v16 = vadd.f32 %v2904_v3, %v2903_v24  ;;  %v2818_v10 = vpop.f32.mrb[34].mxu0  ;;  %v2906_v12 = vpop.f32.mrb[34].mxu1 }
 0x145   : > { %v2819_v63 = vpop.f32.mrb[35].mxu0  ;;  %v2907_v17 = vpop.f32.mrb[35].mxu1 }
 0x146   : > { %v4364_v39 = vadd.f32 %v2905_v16, %v4294_v62  ;;  %v2820_v36 = vadd.f32 %v2819_v63, %v2818_v10  ;;  %v2908_v5 = vadd.f32 %v2907_v17, %v2906_v12 }
 0x147   : > { %2191 = vmatmul.mubr.bf16.gmra.mrb[140].mxu1 %v767_v41  ;;  %3268 = vmatmul.mubr.bf16.gmra.mrb[140].mxu0 %v818_v56 }
 0x148   : > { %v4367_v37 = vadd.f32 %v2908_v5, %v4299_v51 }
 0x14a   : > { %v2821_v61 = vpop.f32.mrb[36].mxu0  ;;  %v2909_v49 = vpop.f32.mrb[36].mxu1 }
 0x14b   : > { %v2822_v44 = vpop.f32.mrb[37].mxu0  ;;  %v2910_v38 = vpop.f32.mrb[37].mxu1 }
 0x14c   : > { %v4369_v1 = vadd.f32 %v2822_v44, %v2821_v61  ;;  %v2911_v33 = vadd.f32 %v2910_v38, %v2909_v49  ;;  %v2824_v14 = vpop.f32.mrb[38].mxu0  ;;  %v2912_v13 = vpop.f32.mrb[38].mxu1 }
 0x14d   : > { %v2825_v35 = vpop.f32.mrb[39].mxu0  ;;  %v2913_v57 = vpop.f32.mrb[39].mxu1 }
 0x14e   : > { %v4372_v62 = vadd.f32 %v2911_v33, %v4308_v20  ;;  %v2826_v7 = vadd.f32 %v2825_v35, %v2824_v14  ;;  %v2914_v21 = vadd.f32 %v2913_v57, %v2912_v13 }
 0x150   : > { %v4375_v55 = vadd.f32 %v2914_v21, %v4313_v31 }
 0x152   : > { %v2827_v51 = vpop.f32.mrb[40].mxu0  ;;  %v2915_v50 = vpop.f32.mrb[40].mxu1 }
 0x153   : > { %v2828_v9 = vpop.f32.mrb[41].mxu0  ;;  %v2916_v58 = vpop.f32.mrb[41].mxu1 }
 0x154   : > { %v4377_v45 = vadd.f32 %v2828_v9, %v2827_v51  ;;  %v2917_v47 = vadd.f32 %v2916_v58, %v2915_v50  ;;  %v2830_v11 = vpop.f32.mrb[42].mxu0  ;;  %v2918_v29 = vpop.f32.mrb[42].mxu1 }
 0x155   : > { %v2831_v27 = vpop.f32.mrb[43].mxu0  ;;  %v2919_v34 = vpop.f32.mrb[43].mxu1 }
 0x156   : > { %v4380_v40 = vadd.f32 %v2917_v47, %v4327_v22  ;;  %v4382_v20 = vadd.f32 %v2831_v27, %v2830_v11  ;;  %v2920_v18 = vadd.f32 %v2919_v34, %v2918_v29 }
 0x158   : > { %v4385_v31 = vadd.f32 %v2920_v18, %v4333_v30 }
 0x15a   : > { %v2833_v4 = vpop.f32.mrb[44].mxu0  ;;  %v2921_v24 = vpop.f32.mrb[44].mxu1 }
 0x15b   : > { %v2834_v60 = vpop.f32.mrb[45].mxu0  ;;  %v2922_v3 = vpop.f32.mrb[45].mxu1 }
 0x15c   : > { %v4387_v41 = vadd.f32 %v2834_v60, %v2833_v4  ;;  %v2923_v56 = vadd.f32 %v2922_v3, %v2921_v24  ;;  %v2836_v16 = vpop.f32.mrb[46].mxu0  ;;  %v2924_v10 = vpop.f32.mrb[46].mxu1 }
 0x15d   : > { %v2837_v12 = vpop.f32.mrb[47].mxu0  ;;  %v2925_v63 = vpop.f32.mrb[47].mxu1 }
 0x15e   : > { %v4390_v22 = vadd.f32 %v2923_v56, %v4345_v6  ;;  %v4392_v17 = vadd.f32 %v2837_v12, %v2836_v16  ;;  %v2926_v5 = vadd.f32 %v2925_v63, %v2924_v10 }
 0x160   : > { %v4395_v30 = vadd.f32 %v2926_v5, %v4350_v32 }
 0x162   : > { %v2927_v61 = vpop.f32.mrb[48].mxu1  ;;  %v2991_v49 = vpop.f32.mrb[48].mxu0 }
 0x163   : > { %v2928_v44 = vpop.f32.mrb[49].mxu1  ;;  %v2992_v38 = vpop.f32.mrb[49].mxu0 }
 0x164   : > { %v2929_v33 = vadd.f32 %v2928_v44, %v2927_v61  ;;  %v2993_v14 = vadd.f32 %v2992_v38, %v2991_v49  ;;  %v2930_v13 = vpop.f32.mrb[50].mxu1  ;;  %v2994_v35 = vpop.f32.mrb[50].mxu0 }
 0x165   : > { %v2931_v57 = vpop.f32.mrb[51].mxu1  ;;  %v2995_v21 = vpop.f32.mrb[51].mxu0 }
 0x166   : > { %v4398_v51 = vadd.f32 %v2929_v33, %v4361_v0  ;;  %v4401_v6 = vadd.f32 %v2993_v14, %v4297_v46  ;;  %v2932_v50 = vadd.f32 %v2931_v57, %v2930_v13  ;;  %v2996_v9 = vadd.f32 %v2995_v21, %v2994_v35 }
 0x168   : > { %v4403_v32 = vadd.f32 %v2932_v50, %v2820_v36  ;;  %v4406_v58 = vadd.f32 %v2996_v9, %v4304_v59 }
 0x16a   : > { %v2933_v47 = vpop.f32.mrb[52].mxu1  ;;  %v2997_v11 = vpop.f32.mrb[52].mxu0 }
 0x16b   : > { %v2934_v29 = vpop.f32.mrb[53].mxu1  ;;  %v2998_v27 = vpop.f32.mrb[53].mxu0 }
 0x16c   : > { %v2935_v34 = vadd.f32 %v2934_v29, %v2933_v47  ;;  %v2999_v18 = vadd.f32 %v2998_v27, %v2997_v11  ;;  %v2936_v4 = vpop.f32.mrb[54].mxu1  ;;  %v3000_v24 = vpop.f32.mrb[54].mxu0 }
 0x16d   : > { %v2937_v0 = vpop.f32.mrb[55].mxu1  ;;  %v3001_v60 = vpop.f32.mrb[55].mxu0 }
 0x16e   : > { %v4409_v46 = vadd.f32 %v2935_v34, %v4369_v1  ;;  %v4412_v3 = vadd.f32 %v2999_v18, %v4311_v2  ;;  %v2938_v36 = vadd.f32 %v2937_v0, %v2936_v4  ;;  %v3002_v56 = vadd.f32 %v3001_v60, %v3000_v24 }
 0x170   : > { %v4414_v59 = vadd.f32 %v2938_v36, %v2826_v7  ;;  %v4417_v16 = vadd.f32 %v3002_v56, %v4318_v28 }
 0x172   : > { %v2939_v10 = vpop.f32.mrb[56].mxu1  ;;  %v3003_v12 = vpop.f32.mrb[56].mxu0 }
 0x173   : > { %v2940_v63 = vpop.f32.mrb[57].mxu1  ;;  %v3004_v5 = vpop.f32.mrb[57].mxu0 }
 0x174   : > { %v2941_v61 = vadd.f32 %v2940_v63, %v2939_v10  ;;  %v3005_v49 = vadd.f32 %v3004_v5, %v3003_v12  ;;  %v2942_v44 = vpop.f32.mrb[58].mxu1  ;;  %v3006_v38 = vpop.f32.mrb[58].mxu0 }
 0x175   : > { %v2943_v1 = vpop.f32.mrb[59].mxu1  ;;  %v3007_v33 = vpop.f32.mrb[59].mxu0 }
 0x176   : > { %v4420_v2 = vadd.f32 %v2941_v61, %v4377_v45  ;;  %v4423_v14 = vadd.f32 %v3005_v49, %v4331_v26  ;;  %v2944_v7 = vadd.f32 %v2943_v1, %v2942_v44  ;;  %v3008_v13 = vadd.f32 %v3007_v33, %v3006_v38 }
 0x178   : > { %v4426_v28 = vadd.f32 %v2944_v7, %v4382_v20  ;;  %v4429_v35 = vadd.f32 %v3008_v13, %v4338_v53 }
 0x17a   : > { %v2945_v57 = vpop.f32.mrb[60].mxu1  ;;  %v3009_v21 = vpop.f32.mrb[60].mxu0 }
 0x17b   : > { %v2946_v50 = vpop.f32.mrb[61].mxu1  ;;  %v3010_v9 = vpop.f32.mrb[61].mxu0 }
 0x17c   : > { %v2947_v47 = vadd.f32 %v2946_v50, %v2945_v57  ;;  %v3011_v11 = vadd.f32 %v3010_v9, %v3009_v21  ;;  %v2948_v29 = vpop.f32.mrb[62].mxu1  ;;  %v3012_v45 = vpop.f32.mrb[62].mxu0 }
 0x17d   : > { %v2949_v27 = vpop.f32.mrb[63].mxu1  ;;  %v3013_v34 = vpop.f32.mrb[63].mxu0 }
 0x17e   : > { %v4432_v26 = vadd.f32 %v2947_v47, %v4387_v41  ;;  %v4435_v18 = vadd.f32 %v3011_v11, %v4348_v15  ;;  %v2950_v20 = vadd.f32 %v2949_v27, %v2948_v29  ;;  %v3014_v4 = vadd.f32 %v3013_v34, %v3012_v45 }
 0x180   : > { %v4438_v53 = vadd.f32 %v2950_v20, %v4392_v17  ;;  %v4441_v24 = vadd.f32 %v3014_v4, %v4355_v23 }
 0x182   : > { %v2951_v0 = vpop.f32.mrb[64].mxu1  ;;  %v3015_v60 = vpop.f32.mrb[64].mxu0 }
 0x183   : > { %v2952_v36 = vpop.f32.mrb[65].mxu1  ;;  %v3016_v56 = vpop.f32.mrb[65].mxu0 }
 0x184   : > { %v2953_v10 = vadd.f32 %v2952_v36, %v2951_v0  ;;  %v3017_v12 = vadd.f32 %v3016_v56, %v3015_v60  ;;  %v2954_v63 = vpop.f32.mrb[66].mxu1  ;;  %v3018_v41 = vpop.f32.mrb[66].mxu0 }
 0x185   : > { %v2955_v5 = vpop.f32.mrb[67].mxu1  ;;  %v3019_v61 = vpop.f32.mrb[67].mxu0 }
 0x186   : > { %v4444_v15 = vadd.f32 %v2953_v10, %v4248_v43  ;;  %v4447_v49 = vadd.f32 %v3017_v12, %v4364_v39  ;;  %v2956_v17 = vadd.f32 %v2955_v5, %v2954_v63  ;;  %v3020_v44 = vadd.f32 %v3019_v61, %v3018_v41 }
 0x188   : > { %v4450_v23 = vadd.f32 %v2956_v17, %v4252_v25  ;;  %v4453_v38 = vadd.f32 %v3020_v44, %v4367_v37 }
 0x18a   : > { %v2957_v1 = vpop.f32.mrb[68].mxu1  ;;  %v3021_v33 = vpop.f32.mrb[68].mxu0 }
 0x18b   : > { %v2958_v7 = vpop.f32.mrb[69].mxu1  ;;  %v3022_v13 = vpop.f32.mrb[69].mxu0 }
 0x18c   : > { %v2959_v57 = vadd.f32 %v2958_v7, %v2957_v1  ;;  %v3023_v21 = vadd.f32 %v3022_v13, %v3021_v33  ;;  %v2960_v50 = vpop.f32.mrb[70].mxu1  ;;  %v3024_v43 = vpop.f32.mrb[70].mxu0 }
 0x18d   : > { %v2961_v9 = vpop.f32.mrb[71].mxu1  ;;  %v3025_v47 = vpop.f32.mrb[71].mxu0 }
 0x18e   : > { %v4456_v39 = vadd.f32 %v2959_v57, %v4260_v48  ;;  %v4459_v11 = vadd.f32 %v3023_v21, %v4372_v62  ;;  %v2962_v25 = vadd.f32 %v2961_v9, %v2960_v50  ;;  %v3026_v29 = vadd.f32 %v3025_v47, %v3024_v43 }
 0x190   : > { %v4462_v37 = vadd.f32 %v2962_v25, %v4264_v42  ;;  %v4465_v45 = vadd.f32 %v3026_v29, %v4375_v55 }
 0x192   : > { %v2963_v27 = vpop.f32.mrb[72].mxu1  ;;  %v3027_v34 = vpop.f32.mrb[72].mxu0 }
 0x193   : > { %v2964_v20 = vpop.f32.mrb[73].mxu1  ;;  %v3028_v4 = vpop.f32.mrb[73].mxu0 }
 0x194   : > { %v2965_v0 = vadd.f32 %v2964_v20, %v2963_v27  ;;  %v3029_v60 = vadd.f32 %v3028_v4, %v3027_v34  ;;  %v2966_v36 = vpop.f32.mrb[74].mxu1  ;;  %v3030_v48 = vpop.f32.mrb[74].mxu0 }
 0x195   : > { %v2967_v56 = vpop.f32.mrb[75].mxu1  ;;  %v3031_v10 = vpop.f32.mrb[75].mxu0 }
 0x196   : > { %v4468_v62 = vadd.f32 %v2965_v0, %v4272_v54  ;;  %v4471_v12 = vadd.f32 %v3029_v60, %v4380_v40  ;;  %v2968_v42 = vadd.f32 %v2967_v56, %v2966_v36  ;;  %v3032_v63 = vadd.f32 %v3031_v10, %v3030_v48 }
 0x198   : > { %v4474_v55 = vadd.f32 %v2968_v42, %v4276_v52  ;;  %v4477_v41 = vadd.f32 %v3032_v63, %v4385_v31 }
 0x19a   : > { %v2969_v5 = vpop.f32.mrb[76].mxu1  ;;  %v3033_v61 = vpop.f32.mrb[76].mxu0 }
 0x19b   : > { %v2970_v17 = vpop.f32.mrb[77].mxu1  ;;  %v3034_v44 = vpop.f32.mrb[77].mxu0 }
 0x19c   : > { %v2971_v1 = vadd.f32 %v2970_v17, %v2969_v5  ;;  %v3035_v33 = vadd.f32 %v3034_v44, %v3033_v61  ;;  %v2972_v7 = vpop.f32.mrb[78].mxu1  ;;  %v3036_v54 = vpop.f32.mrb[78].mxu0 }
 0x19d   : > { %v2973_v13 = vpop.f32.mrb[79].mxu1  ;;  %v3037_v57 = vpop.f32.mrb[79].mxu0 }
 0x19e   : > { %v4480_v40 = vadd.f32 %v2971_v1, %v4284_v8  ;;  %v4483_v21 = vadd.f32 %v3035_v33, %v4390_v22  ;;  %v2974_v52 = vadd.f32 %v2973_v13, %v2972_v7  ;;  %v3038_v50 = vadd.f32 %v3037_v57, %v3036_v54 }
 0x1a0   : > { %v4486_v31 = vadd.f32 %v2974_v52, %v4288_v19  ;;  %v4489_v43 = vadd.f32 %v3038_v50, %v4395_v30 }
 0x1a2   : > { %v3039_v9 = vpop.f32.mrb[80].mxu0  ;;  %v3103_v47 = vpop.f32.mrb[80].mxu1 }
 0x1a3   : > { %v3040_v25 = vpop.f32.mrb[81].mxu0  ;;  %v3104_v29 = vpop.f32.mrb[81].mxu1 }
 0x1a4   : > { %v3041_v27 = vadd.f32 %v3040_v25, %v3039_v9  ;;  %v3105_v34 = vadd.f32 %v3104_v29, %v3103_v47  ;;  %v3042_v20 = vpop.f32.mrb[82].mxu0  ;;  %v3106_v8 = vpop.f32.mrb[82].mxu1 }
 0x1a5   : > { %v3043_v4 = vpop.f32.mrb[83].mxu0  ;;  %v3107_v0 = vpop.f32.mrb[83].mxu1 }
 0x1a6   : > { %v4492_v22 = vadd.f32 %v3041_v27, %v4398_v51  ;;  %v3044_v60 = vadd.f32 %v3043_v4, %v3042_v20  ;;  %v3108_v36 = vadd.f32 %v3107_v0, %v3106_v8  ;;  %v4495_v19 = vadd.f32 %v3105_v34, %v4401_v6 }
 0x1a8   : > { %v4498_v30 = vadd.f32 %v3044_v60, %v4403_v32  ;;  %v4501_v48 = vadd.f32 %v3108_v36, %v4406_v58 }
 0x1aa   : > { %v3045_v56 = vpop.f32.mrb[84].mxu0  ;;  %v3109_v10 = vpop.f32.mrb[84].mxu1 }
 0x1ab   : > { %v3046_v42 = vpop.f32.mrb[85].mxu0  ;;  %v3110_v63 = vpop.f32.mrb[85].mxu1 }
 0x1ac   : > { %v3047_v5 = vadd.f32 %v3046_v42, %v3045_v56  ;;  %v3111_v61 = vadd.f32 %v3110_v63, %v3109_v10  ;;  %v3048_v17 = vpop.f32.mrb[86].mxu0  ;;  %v3112_v51 = vpop.f32.mrb[86].mxu1 }
 0x1ad   : > { %v3049_v44 = vpop.f32.mrb[87].mxu0  ;;  %v3113_v1 = vpop.f32.mrb[87].mxu1 }
 0x1ae   : > { %v4504_v33 = vadd.f32 %v3047_v5, %v4409_v46  ;;  %v3050_v6 = vadd.f32 %v3049_v44, %v3048_v17  ;;  %v3114_v7 = vadd.f32 %v3113_v1, %v3112_v51  ;;  %v4507_v32 = vadd.f32 %v3111_v61, %v4412_v3 }
 0x1b0   : > { %v4510_v58 = vadd.f32 %v3050_v6, %v4414_v59  ;;  %v4513_v54 = vadd.f32 %v3114_v7, %v4417_v16 }
 0x1b2   : > { %v3051_v13 = vpop.f32.mrb[88].mxu0  ;;  %v3115_v57 = vpop.f32.mrb[88].mxu1 }
 0x1b3   : > { %v3052_v52 = vpop.f32.mrb[89].mxu0  ;;  %v3116_v50 = vpop.f32.mrb[89].mxu1 }
 0x1b4   : > { %v3053_v9 = vadd.f32 %v3052_v52, %v3051_v13  ;;  %v3117_v47 = vadd.f32 %v3116_v50, %v3115_v57  ;;  %v3054_v25 = vpop.f32.mrb[90].mxu0  ;;  %v3118_v46 = vpop.f32.mrb[90].mxu1 }
 0x1b5   : > { %v3055_v29 = vpop.f32.mrb[91].mxu0  ;;  %v3119_v27 = vpop.f32.mrb[91].mxu1 }
 0x1b6   : > { %v4516_v34 = vadd.f32 %v3053_v9, %v4420_v2  ;;  %v3056_v3 = vadd.f32 %v3055_v29, %v3054_v25  ;;  %v3120_v20 = vadd.f32 %v3119_v27, %v3118_v46  ;;  %v4519_v59 = vadd.f32 %v3117_v47, %v4423_v14 }
 0x1b8   : > { %v4522_v16 = vadd.f32 %v3056_v3, %v4426_v28  ;;  %v4525_v8 = vadd.f32 %v3120_v20, %v4429_v35 }
 0x1ba   : > { %v3057_v4 = vpop.f32.mrb[92].mxu0  ;;  %v3121_v0 = vpop.f32.mrb[92].mxu1 }
 0x1bb   : > { %v3058_v60 = vpop.f32.mrb[93].mxu0  ;;  %v3122_v36 = vpop.f32.mrb[93].mxu1 }
 0x1bc   : > { %v3059_v56 = vadd.f32 %v3058_v60, %v3057_v4  ;;  %v3123_v10 = vadd.f32 %v3122_v36, %v3121_v0  ;;  %v3060_v42 = vpop.f32.mrb[94].mxu0  ;;  %v3124_v2 = vpop.f32.mrb[94].mxu1 }
 0x1bd   : > { %v3061_v63 = vpop.f32.mrb[95].mxu0  ;;  %v3125_v5 = vpop.f32.mrb[95].mxu1 }
 0x1be   : > { %v4528_v61 = vadd.f32 %v3059_v56, %v4432_v26  ;;  %v3062_v14 = vadd.f32 %v3061_v63, %v3060_v42  ;;  %v3126_v17 = vadd.f32 %v3125_v5, %v3124_v2  ;;  %v4531_v28 = vadd.f32 %v3123_v10, %v4435_v18 }
 0x1c0   : > { %v4534_v35 = vadd.f32 %v3062_v14, %v4438_v53  ;;  %v4537_v51 = vadd.f32 %v3126_v17, %v4441_v24 }
 0x1c2   : > { %v3063_v44 = vpop.f32.mrb[96].mxu0  ;;  %v3127_v1 = vpop.f32.mrb[96].mxu1 }
 0x1c3   : > { %v3064_v6 = vpop.f32.mrb[97].mxu0  ;;  %v3128_v7 = vpop.f32.mrb[97].mxu1 }
 0x1c4   : > { %v3065_v13 = vadd.f32 %v3064_v6, %v3063_v44  ;;  %v3129_v57 = vadd.f32 %v3128_v7, %v3127_v1  ;;  %v3066_v52 = vpop.f32.mrb[98].mxu0  ;;  %v3130_v26 = vpop.f32.mrb[98].mxu1 }
 0x1c5   : > { %v3067_v50 = vpop.f32.mrb[99].mxu0  ;;  %v3131_v9 = vpop.f32.mrb[99].mxu1 }
 0x1c6   : > { %v4540_v47 = vadd.f32 %v3065_v13, %v4444_v15  ;;  %v3068_v18 = vadd.f32 %v3067_v50, %v3066_v52  ;;  %v3132_v25 = vadd.f32 %v3131_v9, %v3130_v26  ;;  %v4543_v53 = vadd.f32 %v3129_v57, %v4447_v49 }
 0x1c8   : > { %v4546_v24 = vadd.f32 %v3068_v18, %v4450_v23  ;;  %v4549_v46 = vadd.f32 %v3132_v25, %v4453_v38 }
 0x1ca   : > { %v3069_v29 = vpop.f32.mrb[100].mxu0  ;;  %v3133_v27 = vpop.f32.mrb[100].mxu1 }
 0x1cb   : > { %v3070_v3 = vpop.f32.mrb[101].mxu0  ;;  %v3134_v20 = vpop.f32.mrb[101].mxu1 }
 0x1cc   : > { %v3071_v4 = vadd.f32 %v3070_v3, %v3069_v29  ;;  %v3135_v0 = vadd.f32 %v3134_v20, %v3133_v27  ;;  %v3072_v60 = vpop.f32.mrb[102].mxu0  ;;  %v3136_v15 = vpop.f32.mrb[102].mxu1 }
 0x1cd   : > { %v3073_v36 = vpop.f32.mrb[103].mxu0  ;;  %v3137_v56 = vpop.f32.mrb[103].mxu1 }
 0x1ce   : > { %v4552_v10 = vadd.f32 %v3071_v4, %v4456_v39  ;;  %v3074_v49 = vadd.f32 %v3073_v36, %v3072_v60  ;;  %v3138_v42 = vadd.f32 %v3137_v56, %v3136_v15  ;;  %v4555_v23 = vadd.f32 %v3135_v0, %v4459_v11 }
 0x1d0   : > { %v4558_v38 = vadd.f32 %v3074_v49, %v4462_v37  ;;  %v4561_v2 = vadd.f32 %v3138_v42, %v4465_v45 }
 0x1d2   : > { %v3075_v63 = vpop.f32.mrb[104].mxu0  ;;  %v3139_v5 = vpop.f32.mrb[104].mxu1 }
 0x1d3   : > { %v3076_v14 = vpop.f32.mrb[105].mxu0  ;;  %v3140_v17 = vpop.f32.mrb[105].mxu1 }
 0x1d4   : > { %v3077_v44 = vadd.f32 %v3076_v14, %v3075_v63  ;;  %v3141_v1 = vadd.f32 %v3140_v17, %v3139_v5  ;;  %v3078_v6 = vpop.f32.mrb[106].mxu0  ;;  %v3142_v39 = vpop.f32.mrb[106].mxu1 }
 0x1d5   : > { %v3079_v7 = vpop.f32.mrb[107].mxu0  ;;  %v3143_v13 = vpop.f32.mrb[107].mxu1 }
 0x1d6   : > { %v4564_v57 = vadd.f32 %v3077_v44, %v4468_v62  ;;  %v3080_v11 = vadd.f32 %v3079_v7, %v3078_v6  ;;  %v3144_v52 = vadd.f32 %v3143_v13, %v3142_v39  ;;  %v4567_v37 = vadd.f32 %v3141_v1, %v4471_v12 }
 0x1d8   : > { %v4570_v45 = vadd.f32 %v3080_v11, %v4474_v55  ;;  %v4573_v26 = vadd.f32 %v3144_v52, %v4477_v41 }
 0x1da   : > { %v3081_v50 = vpop.f32.mrb[108].mxu0  ;;  %v3145_v9 = vpop.f32.mrb[108].mxu1 }
 0x1db   : > { %v3082_v18 = vpop.f32.mrb[109].mxu0  ;;  %v3146_v25 = vpop.f32.mrb[109].mxu1 }
 0x1dc   : > { %v3083_v29 = vadd.f32 %v3082_v18, %v3081_v50  ;;  %v3147_v27 = vadd.f32 %v3146_v25, %v3145_v9  ;;  %v3084_v62 = vpop.f32.mrb[110].mxu0  ;;  %v3148_v3 = vpop.f32.mrb[110].mxu1 }
 0x1dd   : > { %v3085_v20 = vpop.f32.mrb[111].mxu0  ;;  %v3149_v4 = vpop.f32.mrb[111].mxu1 }
 0x1de   : > { %v4576_v12 = vadd.f32 %v3083_v29, %v4480_v40  ;;  %v3086_v0 = vadd.f32 %v3085_v20, %v3084_v62  ;;  %v3150_v55 = vadd.f32 %v3149_v4, %v3148_v3  ;;  %v4579_v60 = vadd.f32 %v3147_v27, %v4483_v21 }
 0x1e0   : > { %v4583_v41 = vadd.f32 %v3086_v0, %v4486_v31  ;;  %v4586_v15 = vadd.f32 %v3150_v55, %v4489_v43 }
 0x1e2   : > { %v3151_v36 = vpop.f32.mrb[112].mxu1  ;;  %v3241_v40 = vpop.f32.mrb[112].mxu0 }
 0x1e3   : > { %v2242_v21 = vadd.f32 %v3241_v40, %v4507_v32  ;;  %v3152_v56 = vpop.f32.mrb[113].mxu1  ;;  %v2233_v49 = vpop.f32.mrb[113].mxu0 }
 0x1e4   : > { %v3153_v31 = vadd.f32 %v3152_v56, %v3151_v36  ;;  %v2234_v42 = vadd.f32 %v2233_v49, %v4495_v19  ;;  %v3154_v43 = vpop.f32.mrb[114].mxu1  ;;  %v3242_v63 = vpop.f32.mrb[114].mxu0 }
 0x1e5   : > { %2362 = vst [vmem:[%s4591_s21 + $0x10] sm:$0xff] %v2242_v21  ;;  %v2245_v5 = vadd.f32 %v3242_v63, %v4513_v54  ;;  %v3155_v14 = vpop.f32.mrb[115].mxu1  ;;  %v2236_v17 = vpop.f32.mrb[115].mxu0  ;;  %v2426_v13 = vmul.f32 %v2242_v21, %v2242_v21 }
 0x1e6   : > { %2360 = vst [vmem:[%s4591_s21] sm:$0xff] %v2234_v42  ;;  %v3156_v44 = vadd.f32 %v3155_v14, %v3154_v43  ;;  %v2237_v1 = vadd.f32 %v2236_v17, %v4501_v48  ;;  %v4600_v6 = vadd.f32 %v3153_v31, %v4492_v22  ;;  %v2424_v32 = vmul.f32 %v2234_v42, %v2234_v42 }
 0x1e7   : > { %2363 = vst [vmem:[%s4591_s21 + $0x18] sm:$0xff] %v2245_v5  ;;  %v2427_v9 = vmul.f32 %v2245_v5, %v2245_v5 }
 0x1e8   : > { %2361 = vst [vmem:[%s4591_s21 + $0x8] sm:$0xff] %v2237_v1  ;;  %v2392_v39 = vadd.f32 %v2237_v1, %v2234_v42  ;;  %v2425_v7 = vmul.f32 %v2237_v1, %v2237_v1  ;;  %v4605_v19 = vadd.f32 %v3156_v44, %v4498_v30 }
 0x1ea   : > { %v2393_v54 = vadd.f32 %v2392_v39, %v2242_v21  ;;  %v2456_v11 = vadd.f32 %v2425_v7, %v2424_v32  ;;  %v3157_v52 = vpop.f32.mrb[116].mxu1  ;;  %v3245_v50 = vpop.f32.mrb[116].mxu0 }
 0x1eb   : > { %v2258_v48 = vadd.f32 %v3245_v50, %v4531_v28  ;;  %v3158_v22 = vpop.f32.mrb[117].mxu1  ;;  %v2249_v18 = vpop.f32.mrb[117].mxu0 }
 0x1ec   : > { %v2457_v25 = vadd.f32 %v2456_v11, %v2426_v13  ;;  %v3159_v29 = vadd.f32 %v3158_v22, %v3157_v52  ;;  %v2250_v27 = vadd.f32 %v2249_v18, %v4519_v59  ;;  %v2394_v62 = vadd.f32 %v2393_v54, %v2245_v5  ;;  %v3160_v30 = vpop.f32.mrb[118].mxu1  ;;  %v3246_v3 = vpop.f32.mrb[118].mxu0 }
 0x1ed   : > { %2366 = vst [vmem:[%s4591_s21 + $0x30] sm:$0xff] %v2258_v48  ;;  %v2261_v20 = vadd.f32 %v3246_v3, %v4537_v51  ;;  %v3161_v4 = vpop.f32.mrb[119].mxu1  ;;  %v2252_v0 = vpop.f32.mrb[119].mxu0  ;;  %v2430_v63 = vmul.f32 %v2258_v48, %v2258_v48 }
 0x1ee   : > { %2364 = vst [vmem:[%s4591_s21 + $0x20] sm:$0xff] %v2250_v27  ;;  %v2395_v55 = vadd.f32 %v2394_v62, %v2250_v27  ;;  %v2428_v36 = vmul.f32 %v2250_v27, %v2250_v27  ;;  %v2458_v28 = vadd.f32 %v2457_v25, %v2427_v9  ;;  %v3162_v40 = vadd.f32 %v3161_v4, %v3160_v30 }
 0x1ef   : > { %2367 = vst [vmem:[%s4591_s21 + $0x38] sm:$0xff] %v2261_v20  ;;  %v2253_v21 = vadd.f32 %v2252_v0, %v4525_v8  ;;  %v4615_v56 = vadd.f32 %v3159_v29, %v4504_v33  ;;  %v2431_v39 = vmul.f32 %v2261_v20, %v2261_v20 }
 0x1f0   : > { %v2459_v59 = vadd.f32 %v2458_v28, %v2428_v36  ;;  %v4618_v49 = vadd.f32 %v3162_v40, %v4510_v58 }
 0x1f1   : > { %2365 = vst [vmem:[%s4591_s21 + $0x28] sm:$0xff] %v2253_v21  ;;  %v2396_v31 = vadd.f32 %v2395_v55, %v2253_v21  ;;  %v2429_v51 = vmul.f32 %v2253_v21, %v2253_v21 }
 0x1f2   : > { %v3163_v42 = vpop.f32.mrb[120].mxu1  ;;  %v3249_v43 = vpop.f32.mrb[120].mxu0 }
 0x1f3   : > { %v2397_v5 = vadd.f32 %v2396_v31, %v2258_v48  ;;  %v2460_v14 = vadd.f32 %v2459_v59, %v2429_v51  ;;  %v2274_v17 = vadd.f32 %v3249_v43, %v4555_v23  ;;  %v3164_v8 = vpop.f32.mrb[121].mxu1  ;;  %v2265_v44 = vpop.f32.mrb[121].mxu0 }
 0x1f4   : > { %v3165_v33 = vadd.f32 %v3164_v8, %v3163_v42  ;;  %v2266_v1 = vadd.f32 %v2265_v44, %v4543_v53  ;;  %v3166_v32 = vpop.f32.mrb[122].mxu1  ;;  %v3250_v58 = vpop.f32.mrb[122].mxu0 }
 0x1f5   : > { %v2461_v7 = vadd.f32 %v2460_v14, %v2430_v63  ;;  %2370 = vst [vmem:[%s4591_s21 + $0x50] sm:$0xff] %v2274_v17  ;;  %v2398_v13 = vadd.f32 %v2397_v5, %v2261_v20  ;;  %v2277_v54 = vadd.f32 %v3250_v58, %v4561_v2  ;;  %v3167_v11 = vpop.f32.mrb[123].mxu1  ;;  %v2268_v52 = vpop.f32.mrb[123].mxu0  ;;  %v2434_v30 = vmul.f32 %v2274_v17, %v2274_v17 }
 0x1f6   : > { %2368 = vst [vmem:[%s4591_s21 + $0x40] sm:$0xff] %v2266_v1  ;;  %v2432_v50 = vmul.f32 %v2266_v1, %v2266_v1  ;;  %v3168_v23 = vadd.f32 %v3167_v11, %v3166_v32  ;;  %v2269_v9 = vadd.f32 %v2268_v52, %v4549_v46  ;;  %v4628_v48 = vadd.f32 %v3165_v33, %v4516_v34 }
 0x1f7   : > { %v2399_v53 = vadd.f32 %v2398_v13, %v2266_v1  ;;  %v2462_v22 = vadd.f32 %v2461_v7, %v2431_v39  ;;  %2371 = vst [vmem:[%s4591_s21 + $0x58] sm:$0xff] %v2277_v54  ;;  %v2435_v28 = vmul.f32 %v2277_v54, %v2277_v54 }
 0x1f8   : > { %2369 = vst [vmem:[%s4591_s21 + $0x48] sm:$0xff] %v2269_v9  ;;  %v2433_v18 = vmul.f32 %v2269_v9, %v2269_v9  ;;  %v4633_v25 = vadd.f32 %v3168_v23, %v4522_v16 }
 0x1f9   : > { %v2463_v29 = vadd.f32 %v2462_v22, %v2432_v50  ;;  %v2400_v2 = vadd.f32 %v2399_v53, %v2269_v9 }
 0x1fa   : > { %v3169_v27 = vpop.f32.mrb[124].mxu1  ;;  %v3253_v62 = vpop.f32.mrb[124].mxu0 }
 0x1fb   : > { %v2401_v3 = vadd.f32 %v2400_v2, %v2274_v17  ;;  %v2464_v46 = vadd.f32 %v2463_v29, %v2433_v18  ;;  %v2290_v34 = vadd.f32 %v3253_v62, %v4579_v60  ;;  %v3170_v20 = vpop.f32.mrb[125].mxu1  ;;  %v2281_v4 = vpop.f32.mrb[125].mxu0 }
 0x1fc   : > { %v3171_v0 = vadd.f32 %v3170_v20, %v3169_v27  ;;  %v2282_v55 = vadd.f32 %v2281_v4, %v4567_v37  ;;  %v3172_v36 = vpop.f32.mrb[126].mxu1  ;;  %v3254_v16 = vpop.f32.mrb[126].mxu0 }
 0x1fd   : > { %v2465_v40 = vadd.f32 %v2464_v46, %v2434_v30  ;;  %2374 = vst [vmem:[%s4591_s21 + $0x70] sm:$0xff] %v2290_v34  ;;  %v2402_v21 = vadd.f32 %v2401_v3, %v2277_v54  ;;  %v2293_v59 = vadd.f32 %v3254_v16, %v4586_v15  ;;  %v3173_v31 = vpop.f32.mrb[127].mxu1  ;;  %v2284_v51 = vpop.f32.mrb[127].mxu0  ;;  %v2438_v1 = vmul.f32 %v2290_v34, %v2290_v34 }
 0x1fe   : > { %2372 = vst [vmem:[%s4591_s21 + $0x60] sm:$0xff] %v2282_v55  ;;  %v2436_v42 = vmul.f32 %v2282_v55, %v2282_v55  ;;  %v3174_v60 = vadd.f32 %v3173_v31, %v3172_v36  ;;  %v2285_v43 = vadd.f32 %v2284_v51, %v4573_v26  ;;  %v2161_v63 = vadd.f32 %v3171_v0, %v4528_v61 }
 0x1ff   : > { %v2403_v37 = vadd.f32 %v2402_v21, %v2282_v55  ;;  %v2466_v5 = vadd.f32 %v2465_v40, %v2435_v28  ;;  %2375 = vst [vmem:[%s4591_s21 + $0x78] sm:$0xff] %v2293_v59 }
 0x200   : > { %2373 = vst [vmem:[%s4591_s21 + $0x68] sm:$0xff] %v2285_v43  ;;  %v2437_v14 = vmul.f32 %v2285_v43, %v2285_v43  ;;  %v2164_v17 = vadd.f32 %v3174_v60, %v4534_v35  ;;  %v2439_v35 = vmul.f32 %v2293_v59, %v2293_v59 }
 0x201   : > { %v2467_v8 = vadd.f32 %v2466_v5, %v2436_v42  ;;  %v2404_v44 = vadd.f32 %v2403_v37, %v2285_v43 }
 0x202   : > { %v3175_v15 = vpop.f32.mrb[128].mxu1  ;;  %v3257_v33 = vpop.f32.mrb[128].mxu0 }
 0x203   : > { %v2405_v32 = vadd.f32 %v2404_v44, %v2290_v34  ;;  %v2468_v58 = vadd.f32 %v2467_v8, %v2437_v14  ;;  %v2306_v26 = vadd.f32 %v3257_v33, %v4615_v56  ;;  %v3176_v39 = vpop.f32.mrb[129].mxu1  ;;  %v2297_v61 = vpop.f32.mrb[129].mxu0 }
 0x204   : > { %v3177_v7 = vadd.f32 %v3176_v39, %v3175_v15  ;;  %v2298_v13 = vadd.f32 %v2297_v61, %v4600_v6  ;;  %v3178_v54 = vpop.f32.mrb[130].mxu1  ;;  %v3258_v11 = vpop.f32.mrb[130].mxu0 }
 0x205   : > { %v2469_v52 = vadd.f32 %v2468_v58, %v2438_v1  ;;  %2378 = vst [vmem:[%s4591_s21 + $0x90] sm:$0xff] %v2306_v26  ;;  %v2406_v50 = vadd.f32 %v2405_v32, %v2293_v59  ;;  %v2309_v23 = vadd.f32 %v3258_v11, %v4618_v49  ;;  %v3179_v9 = vpop.f32.mrb[131].mxu1  ;;  %v2300_v53 = vpop.f32.mrb[131].mxu0  ;;  %v2442_v34 = vmul.f32 %v2306_v26, %v2306_v26 }
 0x206   : > { %2376 = vst [vmem:[%s4591_s21 + $0x80] sm:$0xff] %v2298_v13  ;;  %v2440_v22 = vmul.f32 %v2298_v13, %v2298_v13  ;;  %v3180_v56 = vadd.f32 %v3179_v9, %v3178_v54  ;;  %v2301_v18 = vadd.f32 %v2300_v53, %v4605_v19  ;;  %v2169_v29 = vadd.f32 %v3177_v7, %v4540_v47 }
 0x207   : > { %v2407_v6 = vadd.f32 %v2406_v50, %v2298_v13  ;;  %v2470_v2 = vadd.f32 %v2469_v52, %v2439_v35  ;;  %2379 = vst [vmem:[%s4591_s21 + $0x98] sm:$0xff] %v2309_v23 }
 0x208   : > { %2377 = vst [vmem:[%s4591_s21 + $0x88] sm:$0xff] %v2301_v18  ;;  %v2441_v27 = vmul.f32 %v2301_v18, %v2301_v18  ;;  %v2172_v62 = vadd.f32 %v3180_v56, %v4546_v24  ;;  %v2443_v24 = vmul.f32 %v2309_v23, %v2309_v23 }
 0x209   : > { %v2471_v30 = vadd.f32 %v2470_v2, %v2440_v22  ;;  %v2408_v3 = vadd.f32 %v2407_v6, %v2301_v18 }
 0x20a   : > { %v3181_v49 = vpop.f32.mrb[132].mxu1  ;;  %v3261_v46 = vpop.f32.mrb[132].mxu0 }
 0x20b   : > { %v2409_v20 = vadd.f32 %v2408_v3, %v2306_v26  ;;  %v2472_v4 = vadd.f32 %v2471_v30, %v2441_v27  ;;  %v2322_v0 = vadd.f32 %v3261_v46, %v2161_v63  ;;  %v3182_v19 = vpop.f32.mrb[133].mxu1  ;;  %v2313_v55 = vpop.f32.mrb[133].mxu0 }
 0x20c   : > { %v3183_v47 = vadd.f32 %v3182_v19, %v3181_v49  ;;  %v2314_v36 = vadd.f32 %v2313_v55, %v4628_v48  ;;  %v3184_v16 = vpop.f32.mrb[134].mxu1  ;;  %v3262_v28 = vpop.f32.mrb[134].mxu0 }
 0x20d   : > { %v2473_v40 = vadd.f32 %v2472_v4, %v2442_v34  ;;  %2382 = vst [vmem:[%s4591_s21 + $0xb0] sm:$0xff] %v2322_v0  ;;  %v2410_v21 = vadd.f32 %v2409_v20, %v2309_v23  ;;  %v2325_v59 = vadd.f32 %v3262_v28, %v2164_v17  ;;  %v3185_v31 = vpop.f32.mrb[135].mxu1  ;;  %v2316_v51 = vpop.f32.mrb[135].mxu0  ;;  %v2446_v33 = vmul.f32 %v2322_v0, %v2322_v0 }
 0x20e   : > { %2380 = vst [vmem:[%s4591_s21 + $0xa0] sm:$0xff] %v2314_v36  ;;  %v2444_v42 = vmul.f32 %v2314_v36, %v2314_v36  ;;  %v3186_v60 = vadd.f32 %v3185_v31, %v3184_v16  ;;  %v2317_v43 = vadd.f32 %v2316_v51, %v4633_v25  ;;  %v2177_v63 = vadd.f32 %v3183_v47, %v4552_v10 }
 0x20f   : > { %v2411_v37 = vadd.f32 %v2410_v21, %v2314_v36  ;;  %v2474_v48 = vadd.f32 %v2473_v40, %v2443_v24  ;;  %2383 = vst [vmem:[%s4591_s21 + $0xb8] sm:$0xff] %v2325_v59  ;;  %v2447_v13 = vmul.f32 %v2325_v59, %v2325_v59 }
 0x210   : > { %2381 = vst [vmem:[%s4591_s21 + $0xa8] sm:$0xff] %v2317_v43  ;;  %v2445_v5 = vmul.f32 %v2317_v43, %v2317_v43  ;;  %v2180_v14 = vadd.f32 %v3186_v60, %v4558_v38 }
 0x211   : > { %v2475_v8 = vadd.f32 %v2474_v48, %v2444_v42  ;;  %v2412_v44 = vadd.f32 %v2411_v37, %v2317_v43 }
 0x212   : > { %v3187_v17 = vpop.f32.mrb[136].mxu1  ;;  %v3265_v15 = vpop.f32.mrb[136].mxu0 }
 0x213   : > { %v2413_v1 = vadd.f32 %v2412_v44, %v2322_v0  ;;  %v2476_v32 = vadd.f32 %v2475_v8, %v2445_v5  ;;  %v2338_v58 = vadd.f32 %v3265_v15, %v2177_v63  ;;  %v3188_v25 = vpop.f32.mrb[137].mxu1  ;;  %v2329_v26 = vpop.f32.mrb[137].mxu0 }
 0x214   : > { %v3189_v10 = vadd.f32 %v3188_v25, %v3187_v17  ;;  %v2330_v39 = vadd.f32 %v2329_v26, %v2169_v29  ;;  %v3190_v61 = vpop.f32.mrb[138].mxu1  ;;  %v3266_v7 = vpop.f32.mrb[138].mxu0 }
 0x215   : > { %v2477_v38 = vadd.f32 %v2476_v32, %v2446_v33  ;;  %2386 = vst [vmem:[%s4591_s21 + $0xd0] sm:$0xff] %v2338_v58  ;;  %v2414_v54 = vadd.f32 %v2413_v1, %v2325_v59  ;;  %v2341_v11 = vadd.f32 %v3266_v7, %v2180_v14  ;;  %v3191_v35 = vpop.f32.mrb[139].mxu1  ;;  %v2332_v52 = vpop.f32.mrb[139].mxu0  ;;  %v2450_v3 = vmul.f32 %v2338_v58, %v2338_v58 }
 0x216   : > { %2384 = vst [vmem:[%s4591_s21 + $0xc0] sm:$0xff] %v2330_v39  ;;  %v2448_v50 = vmul.f32 %v2330_v39, %v2330_v39  ;;  %v3192_v23 = vadd.f32 %v3191_v35, %v3190_v61  ;;  %v2333_v9 = vadd.f32 %v2332_v52, %v2172_v62  ;;  %v2185_v53 = vadd.f32 %v3189_v10, %v4564_v57 }
 0x217   : > { %v2415_v22 = vadd.f32 %v2414_v54, %v2330_v39  ;;  %v2478_v56 = vadd.f32 %v2477_v38, %v2447_v13  ;;  %2387 = vst [vmem:[%s4591_s21 + $0xd8] sm:$0xff] %v2341_v11  ;;  %v2451_v19 = vmul.f32 %v2341_v11, %v2341_v11 }
 0x218   : > { %2385 = vst [vmem:[%s4591_s21 + $0xc8] sm:$0xff] %v2333_v9  ;;  %v2449_v18 = vmul.f32 %v2333_v9, %v2333_v9  ;;  %v2188_v29 = vadd.f32 %v3192_v23, %v4570_v45 }
 0x219   : > { %v2479_v6 = vadd.f32 %v2478_v56, %v2448_v50  ;;  %v2416_v2 = vadd.f32 %v2415_v22, %v2333_v9 }
 0x21a   : > { %v3193_v27 = vpop.f32.mrb[140].mxu1  ;;  %v3269_v30 = vpop.f32.mrb[140].mxu0 }
 0x21b   : > { %v2417_v49 = vadd.f32 %v2416_v2, %v2338_v58  ;;  %v2480_v46 = vadd.f32 %v2479_v6, %v2449_v18  ;;  %v3194_v34 = vpop.f32.mrb[141].mxu1  ;;  %v2345_v20 = vpop.f32.mrb[141].mxu0 }
 0x21c   : > { %v3195_v62 = vadd.f32 %v3194_v34, %v3193_v27  ;;  %v2346_v4 = vadd.f32 %v2345_v20, %v2185_v53  ;;  %v3196_v57 = vpop.f32.mrb[142].mxu1  ;;  %v3270_v0 = vpop.f32.mrb[142].mxu0 }
 0x21d   : > { %v2481_v55 = vadd.f32 %v2480_v46, %v2450_v3  ;;  %v2418_v47 = vadd.f32 %v2417_v49, %v2341_v11  ;;  %v3197_v45 = vpop.f32.mrb[143].mxu1  ;;  %v2348_v36 = vpop.f32.mrb[143].mxu0 }
 0x21e   : > { %v2193_v16 = vadd.f32 %v3195_v62, %v4576_v12  ;;  %2388 = vst [vmem:[%s4591_s21 + $0xe0] sm:$0xff] %v2346_v4  ;;  %v2452_v28 = vmul.f32 %v2346_v4, %v2346_v4  ;;  %v3198_v24 = vadd.f32 %v3197_v45, %v3196_v57  ;;  %v2349_v40 = vadd.f32 %v2348_v36, %v2188_v29 }
 0x21f   : > { %v2419_v21 = vadd.f32 %v2418_v47, %v2346_v4  ;;  %v2482_v59 = vadd.f32 %v2481_v55, %v2451_v19 }
 0x220   : > { %v2354_v31 = vadd.f32 %v3269_v30, %v2193_v16  ;;  %v2196_v51 = vadd.f32 %v3198_v24, %v4583_v41  ;;  %2389 = vst [vmem:[%s4591_s21 + $0xe8] sm:$0xff] %v2349_v40  ;;  %v2453_v42 = vmul.f32 %v2349_v40, %v2349_v40 }
 0x221   : > { %v2483_v60 = vadd.f32 %v2482_v59, %v2452_v28  ;;  %v2420_v43 = vadd.f32 %v2419_v21, %v2349_v40 }
 0x222   : > { %2390 = vst [vmem:[%s4591_s21 + $0xf0] sm:$0xff] %v2354_v31  ;;  %v2454_v63 = vmul.f32 %v2354_v31, %v2354_v31  ;;  %v2357_v37 = vadd.f32 %v3270_v0, %v2196_v51 }
 0x223   : > { %v2421_v48 = vadd.f32 %v2420_v43, %v2354_v31  ;;  %v2484_v12 = vadd.f32 %v2483_v60, %v2453_v42 }
 0x224   : > { %2391 = vst [vmem:[%s4591_s21 + $0xf8] sm:$0xff] %v2357_v37  ;;  %v2455_v5 = vmul.f32 %v2357_v37, %v2357_v37 }
 0x225   : > { %v2422_v14 = vadd.f32 %v2421_v48, %v2357_v37  ;;  %v2485_v8 = vadd.f32 %v2484_v12, %v2454_v63 }
 0x227   : > { %2423 = vst [vmem:[%s266_s25] sm:$0xff] %v2422_v14  ;;  %v2486_v41 = vadd.f32 %v2485_v8, %v2455_v5 }
 0x229   : > { %2487 = vst [vmem:[%s273_s28] sm:$0xff] %v2486_v41 }
 0x22a PF: > { %s15_s17 = sadd.s32 1, %s3406_s17   ;;  %s4706_s15 = smov %s3402_s16 }
 0x22b   : > { %p12_p5 = scmp.ge.s32.totalorder %s15_s17, 4   ;;  %s4707_s16 = smov %s4709_s18 }
 0x22d   :  { %14 = sbr.rel (!%p12_p5) target bundleno = 2 (0x2), region = 82 }

</bundles_post_ra>
